<compile_context>
chip_gen: v5e
topology: v5e:2x2
jax: 0.10.0
libtpu: 0.0.40
codegen_flags: <defaults>
</compile_context>

<pallas_src>
import functools

import jax
import jax.numpy as jnp
from jax.experimental import pallas as pl
from jax.experimental.pallas import tpu as pltpu


def resblock_kernel(x_ref, s1_ref, b1_ref, w3_ref, b2_ref, w1_ref, mask_ref,
                    o_ref, im2col_ref, *, B, H, W, C, mm_dtype):
    HW = H * W

    # ---- per image: BN1(eval) + ReLU, then roll-based im2col staged to VMEM ----
    for b in range(B):
        x_b = x_ref[b]                                            # (C, HW) f32
        a = jnp.maximum(x_b * s1_ref[...] + b1_ref[...], 0.0)     # BN1 + ReLU (f32, VPU)
        for dy in range(3):
            for dx in range(3):
                k = dy * 3 + dx
                t = (dy - 1) * W + (dx - 1)                       # flat-pixel tap offset
                # tap[r] = a[r + t]; pltpu.roll == jnp.roll semantics -> shift = -t.
                tap = pltpu.roll(a, shift=(-t) % HW, axis=1) if t != 0 else a
                if not (dy == 1 and dx == 1):
                    # zero the wrapped / out-of-image lanes (f32 mask, sublane-broadcast)
                    tap = tap * mask_ref[k]
                im2col_ref[pl.ds(k * C, C), pl.ds(b * HW, HW)] = tap.astype(mm_dtype)

    # ---- 3x3 conv (BN2 scale pre-folded): ONE MXU matmul, K = 9C, N = B*HW ------
    conv = jnp.dot(w3_ref[...], im2col_ref[...],
                   preferred_element_type=jnp.float32)            # (C, B*HW) f32

    # ---- BN2 shift + ReLU (f32) --------------------------------------------------
    h = jnp.maximum(conv + b2_ref[...], 0.0)

    # ---- 1x1 conv (matmul) + residual --------------------------------------------
    y = jnp.dot(w1_ref[...], h.astype(mm_dtype),
                preferred_element_type=jnp.float32)               # (C, B*HW) f32
    for b in range(B):
        o_ref[b] = (x_ref[b] + y[:, b * HW:(b + 1) * HW]).astype(o_ref.dtype)


def _edge_masks(H, W):
    """(9, 1, HW) f32 multiplicative masks: zero where a 3x3 tap falls outside the image."""
    HW = H * W
    idx = jnp.arange(HW, dtype=jnp.int32)
    ypos = idx // W
    xpos = idx % W
    rows = []
    for dy in range(3):
        for dx in range(3):
            m = jnp.ones((HW,), jnp.float32)
            if dy == 0:
                m = m * (ypos != 0).astype(jnp.float32)
            elif dy == 2:
                m = m * (ypos != H - 1).astype(jnp.float32)
            if dx == 0:
                m = m * (xpos != 0).astype(jnp.float32)
            elif dx == 2:
                m = m * (xpos != W - 1).astype(jnp.float32)
            rows.append(m)
    return jnp.stack(rows, axis=0).reshape(9, 1, HW)


def _pick_images_per_step(N, C, HW, mm_itemsize, vmem_budget_bytes=24 << 20, max_b=8):
    """Images per grid step: fit VMEM budget, keep grid >= 2 (v7x megacore), divide N."""
    # double-buffered f32 in + out blocks, plus the (9C, B*HW) im2col scratch
    per_image = 2 * (2 * C * HW * 4) + 9 * C * HW * mm_itemsize
    cap = max(1, min(max_b, int(vmem_budget_bytes // per_image)))
    if N >= 2:
        cap = min(cap, N // 2)          # grid >= 2 so both v7x TensorCores get work
    cap = max(1, min(cap, N))
    for b in range(cap, 0, -1):
        if N % b == 0:
            return b
    return 1


def resblock_pallas(x_nchw, params, matmul_dtype=jnp.bfloat16):
    s1, b1, w3hwio, s2, b2, w1 = params
    N, C, H, W = x_nchw.shape
    HW = H * W

    # NCHW -> (N, C, H*W): free reshape, no transpose; pixels land in the lane dim.
    x = x_nchw.reshape(N, C, HW).astype(jnp.float32)

    # Fold BN2's scale into the 3x3 conv output channels and flatten the 9 taps:
    # w3mat[co, (dy*3+dx)*C + ci] = s2[co] * K[dy, dx, ci, co]
    w3mat = jnp.transpose(w3hwio, (3, 0, 1, 2)) * s2[:, None, None, None]
    w3mat = w3mat.reshape(C, 9 * C).astype(matmul_dtype)
    w1mat = jnp.transpose(w1, (1, 0)).astype(matmul_dtype)       # (Cout, Cin)

    s1c = s1.reshape(C, 1).astype(jnp.float32)
    b1c = b1.reshape(C, 1).astype(jnp.float32)
    b2c = b2.reshape(C, 1).astype(jnp.float32)
    masks = _edge_masks(H, W)                                     # (9, 1, HW) f32

    itemsize = jnp.dtype(matmul_dtype).itemsize
    B = _pick_images_per_step(N, C, HW, itemsize)
    grid = (N // B,)

    kernel = functools.partial(resblock_kernel, B=B, H=H, W=W, C=C, mm_dtype=matmul_dtype)

    cost = pl.CostEstimate(
        flops=2 * N * HW * (9 * C * C + C * C) + 8 * N * HW * C,
        transcendentals=0,
        bytes_accessed=2 * N * C * HW * 4
        + (9 * C * C + C * C) * itemsize
        + (3 * C + 9 * HW) * 4,
    )

    out = pl.pallas_call(
        kernel,
        out_shape=jax.ShapeDtypeStruct((N, C, HW), jnp.float32),
        grid_spec=pltpu.PrefetchScalarGridSpec(
            num_scalar_prefetch=0,
            grid=grid,                                            # B images per grid step
            in_specs=[
                pl.BlockSpec((B, C, HW), lambda n: (n, 0, 0)),    # x
                pl.BlockSpec((C, 1), lambda n: (0, 0)),           # BN1 scale
                pl.BlockSpec((C, 1), lambda n: (0, 0)),           # BN1 shift
                pl.BlockSpec((C, 9 * C), lambda n: (0, 0)),       # folded 3x3 weights
                pl.BlockSpec((C, 1), lambda n: (0, 0)),           # BN2 shift
                pl.BlockSpec((C, C), lambda n: (0, 0)),           # 1x1 weights
                pl.BlockSpec((9, 1, HW), lambda n: (0, 0, 0)),    # edge masks
            ],
            out_specs=pl.BlockSpec((B, C, HW), lambda n: (n, 0, 0)),
            scratch_shapes=[pltpu.VMEM((9 * C, B * HW), matmul_dtype)],  # staged im2col
        ),
        compiler_params=pltpu.CompilerParams(
            # Only matters on v7x (2 TCs); a no-op on single-TC v5e/v6e.
            dimension_semantics=("parallel",),
            vmem_limit_bytes=32 * 1024 * 1024,
        ),
        cost_estimate=cost,
    )(x, s1c, b1c, w3mat, b2c, w1mat, masks)

    return out.reshape(N, C, H, W)


def resblock_ref(x_nchw, params):
    """Pure-f32 eval-mode reference (ground-truth semantics)."""
    s1, b1, w3hwio, s2, b2, w1 = params
    x = jnp.transpose(x_nchw, (0, 2, 3, 1)).astype(jnp.float32)
    a = jnp.maximum(x * s1 + b1, 0.0)
    y = jax.lax.conv_general_dilated(
        a, w3hwio, window_strides=(1, 1), padding="SAME",
        dimension_numbers=("NHWC", "HWIO", "NHWC"),
        precision=jax.lax.Precision.HIGHEST)
    h = jnp.maximum(y * s2 + b2, 0.0)
    out = x + jnp.einsum("nhwc,cd->nhwd", h, w1, precision=jax.lax.Precision.HIGHEST)
    return jnp.transpose(out, (0, 3, 1, 2))


def resblock_ref_matched(x_nchw, params, matmul_dtype):
    """Reference with the same BN2-folding and matmul-operand casting as the kernel."""
    s1, b1, w3hwio, s2, b2, w1 = params
    x = jnp.transpose(x_nchw, (0, 2, 3, 1)).astype(jnp.float32)
    a = jnp.maximum(x * s1 + b1, 0.0)
    k3 = (w3hwio * s2[None, None, None, :]).astype(matmul_dtype)
    y = jax.lax.conv_general_dilated(
        a.astype(matmul_dtype), k3, window_strides=(1, 1), padding="SAME",
        dimension_numbers=("NHWC", "HWIO", "NHWC"),
        preferred_element_type=jnp.float32)
    h = jnp.maximum(y + b2, 0.0)
    out = x + jnp.einsum("nhwc,cd->nhwd", h.astype(matmul_dtype),
                         w1.astype(matmul_dtype),
                         preferred_element_type=jnp.float32)
    return jnp.transpose(out, (0, 3, 1, 2))


def make_params(key, dim):
    """Deterministic synthetic ResBlock(dim) parameters (PyTorch-layout derived)."""
    ks = jax.random.split(key, 10)
    eps = 1e-5

    # BatchNorm1: folded eval-mode scale/shift
    g1 = 1.0 + 0.1 * jax.random.normal(ks[0], (dim,), jnp.float32)
    be1 = 0.1 * jax.random.normal(ks[1], (dim,), jnp.float32)
    m1 = 0.1 * jax.random.normal(ks[2], (dim,), jnp.float32)
    v1 = jax.random.uniform(ks[3], (dim,), jnp.float32, 0.5, 1.5)
    s1 = g1 / jnp.sqrt(v1 + eps)
    b1 = be1 - m1 * s1

    # Conv2d(dim, dim, 3, 1, 1, bias=False): PyTorch weight (Cout, Cin, kh, kw) -> HWIO
    w3_torch = 0.1 * jax.random.normal(ks[4], (dim, dim, 3, 3), jnp.float32)
    w3hwio = jnp.transpose(w3_torch, (2, 3, 1, 0))            # (kh, kw, Cin, Cout)

    # BatchNorm2
    g2 = 1.0 + 0.1 * jax.random.normal(ks[5], (dim,), jnp.float32)
    be2 = 0.1 * jax.random.normal(ks[6], (dim,), jnp.float32)
    m2 = 0.1 * jax.random.normal(ks[7], (dim,), jnp.float32)
    v2 = jax.random.uniform(ks[8], (dim,), jnp.float32, 0.5, 1.5)
    s2 = g2 / jnp.sqrt(v2 + eps)
    b2 = be2 - m2 * s2

    # Conv2d(dim, dim, 1, bias=False): PyTorch weight (Cout, Cin, 1, 1) -> (Cin, Cout)
    w1_torch = 0.1 * jax.random.normal(ks[9], (dim, dim, 1, 1), jnp.float32)
    w1 = jnp.transpose(w1_torch[:, :, 0, 0], (1, 0))

    return (s1, b1, w3hwio, s2, b2, w1)


if __name__ == "__main__":
    key = jax.random.PRNGKey(0)
    k_x, k_p = jax.random.split(key)

    # N=4 exercises the batched grid (B=2 images/step, grid=2).  dim=32, spatial=16x16.
    N, C, H, W = 4, 32, 16, 16
    x = jax.random.normal(k_x, (N, C, H, W), jnp.float32)
    params = make_params(k_p, C)

    ref32 = jax.block_until_ready(resblock_ref(x, params))

    # f32-at-MXU path: structural-correctness check against the f32 reference.
    out32 = jax.block_until_ready(resblock_pallas(x, params, matmul_dtype=jnp.float32))
    assert out32.shape == x.shape and out32.dtype == jnp.float32
    assert jnp.allclose(out32, ref32, rtol=1e-2, atol=1e-2), "f32 Pallas output mismatch"

    # bf16-at-MXU path (recommended on all chips): tight check vs a precision-matched
    # reference, loose sanity check vs the pure-f32 reference.
    outbf = jax.block_until_ready(resblock_pallas(x, params, matmul_dtype=jnp.bfloat16))
    refbf = jax.block_until_ready(resblock_ref_matched(x, params, jnp.bfloat16))
    assert jnp.allclose(outbf, refbf, rtol=2e-2, atol=2e-2), "bf16 Pallas mismatch vs matched ref"
    assert jnp.allclose(outbf, ref32, rtol=1e-1, atol=1e-1), "bf16 Pallas far from f32 reference"

    print("KERNEL_OK")
</pallas_src>

<mosaic_0001>
module attributes {stable_mosaic.version = 11 : i64} {
  func.func @resblock_kernel(%arg0: i32, %arg1: memref<2x32x256xf32, #tpu.memory_space<vmem>>, %arg2: memref<32x1xf32, #tpu.memory_space<vmem>>, %arg3: memref<32x1xf32, #tpu.memory_space<vmem>>, %arg4: memref<32x288xf32, #tpu.memory_space<vmem>>, %arg5: memref<32x1xf32, #tpu.memory_space<vmem>>, %arg6: memref<32x32xf32, #tpu.memory_space<vmem>>, %arg7: memref<9x1x256xf32, #tpu.memory_space<vmem>>, %arg8: memref<2x32x256xf32, #tpu.memory_space<vmem>>, %arg9: memref<288x512xf32, #tpu.memory_space<vmem>>) attributes {dimension_semantics = [#tpu.dimension_semantics<parallel>], iteration_bounds = array<i64: 2>, scalar_prefetch = 0 : i64, scratch_operands = 1 : i64, tpu.core_type = #tpu.core_type<tc>, window_params = [{transform_indices = @transform_0, window_bounds = array<i64: 2, 32, 256>}, {pipeline_mode = #tpu.pipeline_mode<synchronous>, transform_indices = @transform_1, window_bounds = array<i64: 32, 1>}, {pipeline_mode = #tpu.pipeline_mode<synchronous>, transform_indices = @transform_2, window_bounds = array<i64: 32, 1>}, {pipeline_mode = #tpu.pipeline_mode<synchronous>, transform_indices = @transform_3, window_bounds = array<i64: 32, 288>}, {pipeline_mode = #tpu.pipeline_mode<synchronous>, transform_indices = @transform_4, window_bounds = array<i64: 32, 1>}, {pipeline_mode = #tpu.pipeline_mode<synchronous>, transform_indices = @transform_5, window_bounds = array<i64: 32, 32>}, {pipeline_mode = #tpu.pipeline_mode<synchronous>, transform_indices = @transform_6, window_bounds = array<i64: 9, 1, 256>}, {transform_indices = @transform_7, window_bounds = array<i64: 2, 32, 256>}]} {
    %c0 = arith.constant 0 : index
    %c0_0 = arith.constant 0 : index
    %c0_1 = arith.constant 0 : index
    %0 = vector.load %arg1[%c0, %c0_0, %c0_1] : memref<2x32x256xf32, #tpu.memory_space<vmem>>, vector<1x32x256xf32>
    %1 = vector.shape_cast %0 : vector<1x32x256xf32> to vector<32x256xf32>
    %c0_2 = arith.constant 0 : index
    %c0_3 = arith.constant 0 : index
    %2 = vector.load %arg2[%c0_2, %c0_3] : memref<32x1xf32, #tpu.memory_space<vmem>>, vector<32x1xf32>
    %3 = vector.broadcast %2 : vector<32x1xf32> to vector<32x256xf32>
    %4 = arith.mulf %1, %3 : vector<32x256xf32>
    %c0_4 = arith.constant 0 : index
    %c0_5 = arith.constant 0 : index
    %5 = vector.load %arg3[%c0_4, %c0_5] : memref<32x1xf32, #tpu.memory_space<vmem>>, vector<32x1xf32>
    %6 = vector.broadcast %5 : vector<32x1xf32> to vector<32x256xf32>
    %7 = arith.addf %4, %6 : vector<32x256xf32>
    %cst = arith.constant 0.000000e+00 : f32
    %8 = vector.broadcast %cst : f32 to vector<32x256xf32>
    %9 = arith.maximumf %7, %8 : vector<32x256xf32>
    %c17_i32 = arith.constant 17 : i32
    %10 = tpu.dynamic_rotate %9 by %c17_i32 dim 1 : vector<32x256xf32>, i32 -> vector<32x256xf32>
    %c0_6 = arith.constant 0 : index
    %c0_7 = arith.constant 0 : index
    %c0_8 = arith.constant 0 : index
    %11 = vector.load %arg7[%c0_6, %c0_7, %c0_8] : memref<9x1x256xf32, #tpu.memory_space<vmem>>, vector<1x1x256xf32>
    %12 = vector.shape_cast %11 : vector<1x1x256xf32> to vector<1x256xf32>
    %13 = vector.broadcast %12 : vector<1x256xf32> to vector<32x256xf32>
    %14 = arith.mulf %10, %13 : vector<32x256xf32>
    %c0_9 = arith.constant 0 : index
    %c0_10 = arith.constant 0 : index
    %15 = vector.load %arg9[%c0_9, %c0_10] : memref<288x512xf32, #tpu.memory_space<vmem>>, vector<32x256xf32>
    tpu.vector_store %arg9[%c0_9, %c0_10], %14 {strides = array<i32>} : memref<288x512xf32, #tpu.memory_space<vmem>>, vector<32x256xf32>,
    %c16_i32 = arith.constant 16 : i32
    %16 = tpu.dynamic_rotate %9 by %c16_i32 dim 1 : vector<32x256xf32>, i32 -> vector<32x256xf32>
    %c1 = arith.constant 1 : index
    %c0_11 = arith.constant 0 : index
    %c0_12 = arith.constant 0 : index
    %17 = vector.load %arg7[%c1, %c0_11, %c0_12] : memref<9x1x256xf32, #tpu.memory_space<vmem>>, vector<1x1x256xf32>
    %18 = vector.shape_cast %17 : vector<1x1x256xf32> to vector<1x256xf32>
    %19 = vector.broadcast %18 : vector<1x256xf32> to vector<32x256xf32>
    %20 = arith.mulf %16, %19 : vector<32x256xf32>
    %c32 = arith.constant 32 : index
    %c0_13 = arith.constant 0 : index
    %21 = vector.load %arg9[%c32, %c0_13] : memref<288x512xf32, #tpu.memory_space<vmem>>, vector<32x256xf32>
    tpu.vector_store %arg9[%c32, %c0_13], %20 {strides = array<i32>} : memref<288x512xf32, #tpu.memory_space<vmem>>, vector<32x256xf32>,
    %c15_i32 = arith.constant 15 : i32
    %22 = tpu.dynamic_rotate %9 by %c15_i32 dim 1 : vector<32x256xf32>, i32 -> vector<32x256xf32>
    %c2 = arith.constant 2 : index
    %c0_14 = arith.constant 0 : index
    %c0_15 = arith.constant 0 : index
    %23 = vector.load %arg7[%c2, %c0_14, %c0_15] : memref<9x1x256xf32, #tpu.memory_space<vmem>>, vector<1x1x256xf32>
    %24 = vector.shape_cast %23 : vector<1x1x256xf32> to vector<1x256xf32>
    %25 = vector.broadcast %24 : vector<1x256xf32> to vector<32x256xf32>
    %26 = arith.mulf %22, %25 : vector<32x256xf32>
    %c64 = arith.constant 64 : index
    %c0_16 = arith.constant 0 : index
    %27 = vector.load %arg9[%c64, %c0_16] : memref<288x512xf32, #tpu.memory_space<vmem>>, vector<32x256xf32>
    tpu.vector_store %arg9[%c64, %c0_16], %26 {strides = array<i32>} : memref<288x512xf32, #tpu.memory_space<vmem>>, vector<32x256xf32>,
    %c1_i32 = arith.constant 1 : i32
    %28 = tpu.dynamic_rotate %9 by %c1_i32 dim 1 : vector<32x256xf32>, i32 -> vector<32x256xf32>
    %c3 = arith.constant 3 : index
    %c0_17 = arith.constant 0 : index
    %c0_18 = arith.constant 0 : index
    %29 = vector.load %arg7[%c3, %c0_17, %c0_18] : memref<9x1x256xf32, #tpu.memory_space<vmem>>, vector<1x1x256xf32>
    %30 = vector.shape_cast %29 : vector<1x1x256xf32> to vector<1x256xf32>
    %31 = vector.broadcast %30 : vector<1x256xf32> to vector<32x256xf32>
    %32 = arith.mulf %28, %31 : vector<32x256xf32>
    %c96 = arith.constant 96 : index
    %c0_19 = arith.constant 0 : index
    %33 = vector.load %arg9[%c96, %c0_19] : memref<288x512xf32, #tpu.memory_space<vmem>>, vector<32x256xf32>
    tpu.vector_store %arg9[%c96, %c0_19], %32 {strides = array<i32>} : memref<288x512xf32, #tpu.memory_space<vmem>>, vector<32x256xf32>,
    %c128 = arith.constant 128 : index
    %c0_20 = arith.constant 0 : index
    %34 = vector.load %arg9[%c128, %c0_20] : memref<288x512xf32, #tpu.memory_space<vmem>>, vector<32x256xf32>
    tpu.vector_store %arg9[%c128, %c0_20], %9 {strides = array<i32>} : memref<288x512xf32, #tpu.memory_space<vmem>>, vector<32x256xf32>,
    %c255_i32 = arith.constant 255 : i32
    %35 = tpu.dynamic_rotate %9 by %c255_i32 dim 1 : vector<32x256xf32>, i32 -> vector<32x256xf32>
    %c5 = arith.constant 5 : index
    %c0_21 = arith.constant 0 : index
    %c0_22 = arith.constant 0 : index
    %36 = vector.load %arg7[%c5, %c0_21, %c0_22] : memref<9x1x256xf32, #tpu.memory_space<vmem>>, vector<1x1x256xf32>
    %37 = vector.shape_cast %36 : vector<1x1x256xf32> to vector<1x256xf32>
    %38 = vector.broadcast %37 : vector<1x256xf32> to vector<32x256xf32>
    %39 = arith.mulf %35, %38 : vector<32x256xf32>
    %c160 = arith.constant 160 : index
    %c0_23 = arith.constant 0 : index
    %40 = vector.load %arg9[%c160, %c0_23] : memref<288x512xf32, #tpu.memory_space<vmem>>, vector<32x256xf32>
    tpu.vector_store %arg9[%c160, %c0_23], %39 {strides = array<i32>} : memref<288x512xf32, #tpu.memory_space<vmem>>, vector<32x256xf32>,
    %c241_i32 = arith.constant 241 : i32
    %41 = tpu.dynamic_rotate %9 by %c241_i32 dim 1 : vector<32x256xf32>, i32 -> vector<32x256xf32>
    %c6 = arith.constant 6 : index
    %c0_24 = arith.constant 0 : index
    %c0_25 = arith.constant 0 : index
    %42 = vector.load %arg7[%c6, %c0_24, %c0_25] : memref<9x1x256xf32, #tpu.memory_space<vmem>>, vector<1x1x256xf32>
    %43 = vector.shape_cast %42 : vector<1x1x256xf32> to vector<1x256xf32>
    %44 = vector.broadcast %43 : vector<1x256xf32> to vector<32x256xf32>
    %45 = arith.mulf %41, %44 : vector<32x256xf32>
    %c192 = arith.constant 192 : index
    %c0_26 = arith.constant 0 : index
    %46 = vector.load %arg9[%c192, %c0_26] : memref<288x512xf32, #tpu.memory_space<vmem>>, vector<32x256xf32>
    tpu.vector_store %arg9[%c192, %c0_26], %45 {strides = array<i32>} : memref<288x512xf32, #tpu.memory_space<vmem>>, vector<32x256xf32>,
    %c240_i32 = arith.constant 240 : i32
    %47 = tpu.dynamic_rotate %9 by %c240_i32 dim 1 : vector<32x256xf32>, i32 -> vector<32x256xf32>
    %c7 = arith.constant 7 : index
    %c0_27 = arith.constant 0 : index
    %c0_28 = arith.constant 0 : index
    %48 = vector.load %arg7[%c7, %c0_27, %c0_28] : memref<9x1x256xf32, #tpu.memory_space<vmem>>, vector<1x1x256xf32>
    %49 = vector.shape_cast %48 : vector<1x1x256xf32> to vector<1x256xf32>
    %50 = vector.broadcast %49 : vector<1x256xf32> to vector<32x256xf32>
    %51 = arith.mulf %47, %50 : vector<32x256xf32>
    %c224 = arith.constant 224 : index
    %c0_29 = arith.constant 0 : index
    %52 = vector.load %arg9[%c224, %c0_29] : memref<288x512xf32, #tpu.memory_space<vmem>>, vector<32x256xf32>
    tpu.vector_store %arg9[%c224, %c0_29], %51 {strides = array<i32>} : memref<288x512xf32, #tpu.memory_space<vmem>>, vector<32x256xf32>,
    %c239_i32 = arith.constant 239 : i32
    %53 = tpu.dynamic_rotate %9 by %c239_i32 dim 1 : vector<32x256xf32>, i32 -> vector<32x256xf32>
    %c8 = arith.constant 8 : index
    %c0_30 = arith.constant 0 : index
    %c0_31 = arith.constant 0 : index
    %54 = vector.load %arg7[%c8, %c0_30, %c0_31] : memref<9x1x256xf32, #tpu.memory_space<vmem>>, vector<1x1x256xf32>
    %55 = vector.shape_cast %54 : vector<1x1x256xf32> to vector<1x256xf32>
    %56 = vector.broadcast %55 : vector<1x256xf32> to vector<32x256xf32>
    %57 = arith.mulf %53, %56 : vector<32x256xf32>
    %c256 = arith.constant 256 : index
    %c0_32 = arith.constant 0 : index
    %58 = vector.load %arg9[%c256, %c0_32] : memref<288x512xf32, #tpu.memory_space<vmem>>, vector<32x256xf32>
    tpu.vector_store %arg9[%c256, %c0_32], %57 {strides = array<i32>} : memref<288x512xf32, #tpu.memory_space<vmem>>, vector<32x256xf32>,
    %c1_33 = arith.constant 1 : index
    %c0_34 = arith.constant 0 : index
    %c0_35 = arith.constant 0 : index
    %59 = vector.load %arg1[%c1_33, %c0_34, %c0_35] : memref<2x32x256xf32, #tpu.memory_space<vmem>>, vector<1x32x256xf32>
    %60 = vector.shape_cast %59 : vector<1x32x256xf32> to vector<32x256xf32>
    %c0_36 = arith.constant 0 : index
    %c0_37 = arith.constant 0 : index
    %61 = vector.load %arg2[%c0_36, %c0_37] : memref<32x1xf32, #tpu.memory_space<vmem>>, vector<32x1xf32>
    %62 = vector.broadcast %61 : vector<32x1xf32> to vector<32x256xf32>
    %63 = arith.mulf %60, %62 : vector<32x256xf32>
    %c0_38 = arith.constant 0 : index
    %c0_39 = arith.constant 0 : index
    %64 = vector.load %arg3[%c0_38, %c0_39] : memref<32x1xf32, #tpu.memory_space<vmem>>, vector<32x1xf32>
    %65 = vector.broadcast %64 : vector<32x1xf32> to vector<32x256xf32>
    %66 = arith.addf %63, %65 : vector<32x256xf32>
    %cst_40 = arith.constant 0.000000e+00 : f32
    %67 = vector.broadcast %cst_40 : f32 to vector<32x256xf32>
    %68 = arith.maximumf %66, %67 : vector<32x256xf32>
    %c17_i32_41 = arith.constant 17 : i32
    %69 = tpu.dynamic_rotate %68 by %c17_i32_41 dim 1 : vector<32x256xf32>, i32 -> vector<32x256xf32>
    %c0_42 = arith.constant 0 : index
    %c0_43 = arith.constant 0 : index
    %c0_44 = arith.constant 0 : index
    %70 = vector.load %arg7[%c0_42, %c0_43, %c0_44] : memref<9x1x256xf32, #tpu.memory_space<vmem>>, vector<1x1x256xf32>
    %71 = vector.shape_cast %70 : vector<1x1x256xf32> to vector<1x256xf32>
    %72 = vector.broadcast %71 : vector<1x256xf32> to vector<32x256xf32>
    %73 = arith.mulf %69, %72 : vector<32x256xf32>
    %c0_45 = arith.constant 0 : index
    %c256_46 = arith.constant 256 : index
    %74 = vector.load %arg9[%c0_45, %c256_46] : memref<288x512xf32, #tpu.memory_space<vmem>>, vector<32x256xf32>
    tpu.vector_store %arg9[%c0_45, %c256_46], %73 {strides = array<i32>} : memref<288x512xf32, #tpu.memory_space<vmem>>, vector<32x256xf32>,
    %c16_i32_47 = arith.constant 16 : i32
    %75 = tpu.dynamic_rotate %68 by %c16_i32_47 dim 1 : vector<32x256xf32>, i32 -> vector<32x256xf32>
    %c1_48 = arith.constant 1 : index
    %c0_49 = arith.constant 0 : index
    %c0_50 = arith.constant 0 : index
    %76 = vector.load %arg7[%c1_48, %c0_49, %c0_50] : memref<9x1x256xf32, #tpu.memory_space<vmem>>, vector<1x1x256xf32>
    %77 = vector.shape_cast %76 : vector<1x1x256xf32> to vector<1x256xf32>
    %78 = vector.broadcast %77 : vector<1x256xf32> to vector<32x256xf32>
    %79 = arith.mulf %75, %78 : vector<32x256xf32>
    %c32_51 = arith.constant 32 : index
    %c256_52 = arith.constant 256 : index
    %80 = vector.load %arg9[%c32_51, %c256_52] : memref<288x512xf32, #tpu.memory_space<vmem>>, vector<32x256xf32>
    tpu.vector_store %arg9[%c32_51, %c256_52], %79 {strides = array<i32>} : memref<288x512xf32, #tpu.memory_space<vmem>>, vector<32x256xf32>,
    %c15_i32_53 = arith.constant 15 : i32
    %81 = tpu.dynamic_rotate %68 by %c15_i32_53 dim 1 : vector<32x256xf32>, i32 -> vector<32x256xf32>
    %c2_54 = arith.constant 2 : index
    %c0_55 = arith.constant 0 : index
    %c0_56 = arith.constant 0 : index
    %82 = vector.load %arg7[%c2_54, %c0_55, %c0_56] : memref<9x1x256xf32, #tpu.memory_space<vmem>>, vector<1x1x256xf32>
    %83 = vector.shape_cast %82 : vector<1x1x256xf32> to vector<1x256xf32>
    %84 = vector.broadcast %83 : vector<1x256xf32> to vector<32x256xf32>
    %85 = arith.mulf %81, %84 : vector<32x256xf32>
    %c64_57 = arith.constant 64 : index
    %c256_58 = arith.constant 256 : index
    %86 = vector.load %arg9[%c64_57, %c256_58] : memref<288x512xf32, #tpu.memory_space<vmem>>, vector<32x256xf32>
    tpu.vector_store %arg9[%c64_57, %c256_58], %85 {strides = array<i32>} : memref<288x512xf32, #tpu.memory_space<vmem>>, vector<32x256xf32>,
    %c1_i32_59 = arith.constant 1 : i32
    %87 = tpu.dynamic_rotate %68 by %c1_i32_59 dim 1 : vector<32x256xf32>, i32 -> vector<32x256xf32>
    %c3_60 = arith.constant 3 : index
    %c0_61 = arith.constant 0 : index
    %c0_62 = arith.constant 0 : index
    %88 = vector.load %arg7[%c3_60, %c0_61, %c0_62] : memref<9x1x256xf32, #tpu.memory_space<vmem>>, vector<1x1x256xf32>
    %89 = vector.shape_cast %88 : vector<1x1x256xf32> to vector<1x256xf32>
    %90 = vector.broadcast %89 : vector<1x256xf32> to vector<32x256xf32>
    %91 = arith.mulf %87, %90 : vector<32x256xf32>
    %c96_63 = arith.constant 96 : index
    %c256_64 = arith.constant 256 : index
    %92 = vector.load %arg9[%c96_63, %c256_64] : memref<288x512xf32, #tpu.memory_space<vmem>>, vector<32x256xf32>
    tpu.vector_store %arg9[%c96_63, %c256_64], %91 {strides = array<i32>} : memref<288x512xf32, #tpu.memory_space<vmem>>, vector<32x256xf32>,
    %c128_65 = arith.constant 128 : index
    %c256_66 = arith.constant 256 : index
    %93 = vector.load %arg9[%c128_65, %c256_66] : memref<288x512xf32, #tpu.memory_space<vmem>>, vector<32x256xf32>
    tpu.vector_store %arg9[%c128_65, %c256_66], %68 {strides = array<i32>} : memref<288x512xf32, #tpu.memory_space<vmem>>, vector<32x256xf32>,
    %c255_i32_67 = arith.constant 255 : i32
    %94 = tpu.dynamic_rotate %68 by %c255_i32_67 dim 1 : vector<32x256xf32>, i32 -> vector<32x256xf32>
    %c5_68 = arith.constant 5 : index
    %c0_69 = arith.constant 0 : index
    %c0_70 = arith.constant 0 : index
    %95 = vector.load %arg7[%c5_68, %c0_69, %c0_70] : memref<9x1x256xf32, #tpu.memory_space<vmem>>, vector<1x1x256xf32>
    %96 = vector.shape_cast %95 : vector<1x1x256xf32> to vector<1x256xf32>
    %97 = vector.broadcast %96 : vector<1x256xf32> to vector<32x256xf32>
    %98 = arith.mulf %94, %97 : vector<32x256xf32>
    %c160_71 = arith.constant 160 : index
    %c256_72 = arith.constant 256 : index
    %99 = vector.load %arg9[%c160_71, %c256_72] : memref<288x512xf32, #tpu.memory_space<vmem>>, vector<32x256xf32>
    tpu.vector_store %arg9[%c160_71, %c256_72], %98 {strides = array<i32>} : memref<288x512xf32, #tpu.memory_space<vmem>>, vector<32x256xf32>,
    %c241_i32_73 = arith.constant 241 : i32
    %100 = tpu.dynamic_rotate %68 by %c241_i32_73 dim 1 : vector<32x256xf32>, i32 -> vector<32x256xf32>
    %c6_74 = arith.constant 6 : index
    %c0_75 = arith.constant 0 : index
    %c0_76 = arith.constant 0 : index
    %101 = vector.load %arg7[%c6_74, %c0_75, %c0_76] : memref<9x1x256xf32, #tpu.memory_space<vmem>>, vector<1x1x256xf32>
    %102 = vector.shape_cast %101 : vector<1x1x256xf32> to vector<1x256xf32>
    %103 = vector.broadcast %102 : vector<1x256xf32> to vector<32x256xf32>
    %104 = arith.mulf %100, %103 : vector<32x256xf32>
    %c192_77 = arith.constant 192 : index
    %c256_78 = arith.constant 256 : index
    %105 = vector.load %arg9[%c192_77, %c256_78] : memref<288x512xf32, #tpu.memory_space<vmem>>, vector<32x256xf32>
    tpu.vector_store %arg9[%c192_77, %c256_78], %104 {strides = array<i32>} : memref<288x512xf32, #tpu.memory_space<vmem>>, vector<32x256xf32>,
    %c240_i32_79 = arith.constant 240 : i32
    %106 = tpu.dynamic_rotate %68 by %c240_i32_79 dim 1 : vector<32x256xf32>, i32 -> vector<32x256xf32>
    %c7_80 = arith.constant 7 : index
    %c0_81 = arith.constant 0 : index
    %c0_82 = arith.constant 0 : index
    %107 = vector.load %arg7[%c7_80, %c0_81, %c0_82] : memref<9x1x256xf32, #tpu.memory_space<vmem>>, vector<1x1x256xf32>
    %108 = vector.shape_cast %107 : vector<1x1x256xf32> to vector<1x256xf32>
    %109 = vector.broadcast %108 : vector<1x256xf32> to vector<32x256xf32>
    %110 = arith.mulf %106, %109 : vector<32x256xf32>
    %c224_83 = arith.constant 224 : index
    %c256_84 = arith.constant 256 : index
    %111 = vector.load %arg9[%c224_83, %c256_84] : memref<288x512xf32, #tpu.memory_space<vmem>>, vector<32x256xf32>
    tpu.vector_store %arg9[%c224_83, %c256_84], %110 {strides = array<i32>} : memref<288x512xf32, #tpu.memory_space<vmem>>, vector<32x256xf32>,
    %c239_i32_85 = arith.constant 239 : i32
    %112 = tpu.dynamic_rotate %68 by %c239_i32_85 dim 1 : vector<32x256xf32>, i32 -> vector<32x256xf32>
    %c8_86 = arith.constant 8 : index
    %c0_87 = arith.constant 0 : index
    %c0_88 = arith.constant 0 : index
    %113 = vector.load %arg7[%c8_86, %c0_87, %c0_88] : memref<9x1x256xf32, #tpu.memory_space<vmem>>, vector<1x1x256xf32>
    %114 = vector.shape_cast %113 : vector<1x1x256xf32> to vector<1x256xf32>
    %115 = vector.broadcast %114 : vector<1x256xf32> to vector<32x256xf32>
    %116 = arith.mulf %112, %115 : vector<32x256xf32>
    %c256_89 = arith.constant 256 : index
    %c256_90 = arith.constant 256 : index
    %117 = vector.load %arg9[%c256_89, %c256_90] : memref<288x512xf32, #tpu.memory_space<vmem>>, vector<32x256xf32>
    tpu.vector_store %arg9[%c256_89, %c256_90], %116 {strides = array<i32>} : memref<288x512xf32, #tpu.memory_space<vmem>>, vector<32x256xf32>,
    %c0_91 = arith.constant 0 : index
    %c0_92 = arith.constant 0 : index
    %118 = vector.load %arg4[%c0_91, %c0_92] : memref<32x288xf32, #tpu.memory_space<vmem>>, vector<32x288xf32>
    %c0_93 = arith.constant 0 : index
    %c0_94 = arith.constant 0 : index
    %119 = vector.load %arg9[%c0_93, %c0_94] : memref<288x512xf32, #tpu.memory_space<vmem>>, vector<288x512xf32>
    %cst_95 = arith.constant dense<0.000000e+00> : vector<32x512xf32>
    %120 = tpu.matmul %118, %119, %cst_95 {dimension_numbers = #tpu.dot_dimension_numbers<[1], [0], [0], [1], [0, 0, 1, 1], [], []>} : vector<32x288xf32>, vector<288x512xf32>, vector<32x512xf32> -> vector<32x512xf32>
    %c0_96 = arith.constant 0 : index
    %c0_97 = arith.constant 0 : index
    %121 = vector.load %arg5[%c0_96, %c0_97] : memref<32x1xf32, #tpu.memory_space<vmem>>, vector<32x1xf32>
    %122 = vector.broadcast %121 : vector<32x1xf32> to vector<32x512xf32>
    %123 = arith.addf %120, %122 : vector<32x512xf32>
    %cst_98 = arith.constant 0.000000e+00 : f32
    %124 = vector.broadcast %cst_98 : f32 to vector<32x512xf32>
    %125 = arith.maximumf %123, %124 : vector<32x512xf32>
    %c0_99 = arith.constant 0 : index
    %c0_100 = arith.constant 0 : index
    %126 = vector.load %arg6[%c0_99, %c0_100] : memref<32x32xf32, #tpu.memory_space<vmem>>, vector<32x32xf32>
    %cst_101 = arith.constant dense<0.000000e+00> : vector<32x512xf32>
    %127 = tpu.matmul %126, %125, %cst_101 {dimension_numbers = #tpu.dot_dimension_numbers<[1], [0], [0], [1], [0, 0, 1, 1], [], []>} : vector<32x32xf32>, vector<32x512xf32>, vector<32x512xf32> -> vector<32x512xf32>
    %c0_102 = arith.constant 0 : index
    %c0_103 = arith.constant 0 : index
    %c0_104 = arith.constant 0 : index
    %128 = vector.load %arg1[%c0_102, %c0_103, %c0_104] : memref<2x32x256xf32, #tpu.memory_space<vmem>>, vector<1x32x256xf32>
    %129 = vector.shape_cast %128 : vector<1x32x256xf32> to vector<32x256xf32>
    %130 = vector.extract_strided_slice %127 {offsets = [0, 0], sizes = [32, 256], strides = [1, 1]} : vector<32x512xf32> to vector<32x256xf32>
    %131 = arith.addf %129, %130 : vector<32x256xf32>
    %c0_105 = arith.constant 0 : index
    %c0_106 = arith.constant 0 : index
    %c0_107 = arith.constant 0 : index
    %132 = vector.load %arg8[%c0_105, %c0_106, %c0_107] : memref<2x32x256xf32, #tpu.memory_space<vmem>>, vector<1x32x256xf32>
    %133 = vector.shape_cast %132 : vector<1x32x256xf32> to vector<32x256xf32>
    %134 = vector.shape_cast %131 : vector<32x256xf32> to vector<1x32x256xf32>
    tpu.vector_store %arg8[%c0_105, %c0_106, %c0_107], %134 {strides = array<i32>} : memref<2x32x256xf32, #tpu.memory_space<vmem>>, vector<1x32x256xf32>,
    %c1_108 = arith.constant 1 : index
    %c0_109 = arith.constant 0 : index
    %c0_110 = arith.constant 0 : index
    %135 = vector.load %arg1[%c1_108, %c0_109, %c0_110] : memref<2x32x256xf32, #tpu.memory_space<vmem>>, vector<1x32x256xf32>
    %136 = vector.shape_cast %135 : vector<1x32x256xf32> to vector<32x256xf32>
    %137 = vector.extract_strided_slice %127 {offsets = [0, 256], sizes = [32, 256], strides = [1, 1]} : vector<32x512xf32> to vector<32x256xf32>
    %138 = arith.addf %136, %137 : vector<32x256xf32>
    %c1_111 = arith.constant 1 : index
    %c0_112 = arith.constant 0 : index
    %c0_113 = arith.constant 0 : index
    %139 = vector.load %arg8[%c1_111, %c0_112, %c0_113] : memref<2x32x256xf32, #tpu.memory_space<vmem>>, vector<1x32x256xf32>
    %140 = vector.shape_cast %139 : vector<1x32x256xf32> to vector<32x256xf32>
    %141 = vector.shape_cast %138 : vector<32x256xf32> to vector<1x32x256xf32>
    tpu.vector_store %arg8[%c1_111, %c0_112, %c0_113], %141 {strides = array<i32>} : memref<2x32x256xf32, #tpu.memory_space<vmem>>, vector<1x32x256xf32>,
    return
  }
  func.func @transform_0(%arg0: i32) -> (i32, i32, i32) {
    %c0_i32 = arith.constant 0 : i32
    %c0_i32_0 = arith.constant 0 : i32
    %c0_i32_1 = arith.constant 0 : i32
    return %arg0, %c0_i32, %c0_i32_0 : i32, i32, i32
  }
  func.func @transform_1(%arg0: i32) -> (i32, i32) {
    %c0_i32 = arith.constant 0 : i32
    %c0_i32_0 = arith.constant 0 : i32
    %c0_i32_1 = arith.constant 0 : i32
    return %c0_i32, %c0_i32_0 : i32, i32
  }
  func.func @transform_2(%arg0: i32) -> (i32, i32) {
    %c0_i32 = arith.constant 0 : i32
    %c0_i32_0 = arith.constant 0 : i32
    %c0_i32_1 = arith.constant 0 : i32
    return %c0_i32, %c0_i32_0 : i32, i32
  }
  func.func @transform_3(%arg0: i32) -> (i32, i32) {
    %c0_i32 = arith.constant 0 : i32
    %c0_i32_0 = arith.constant 0 : i32
    %c0_i32_1 = arith.constant 0 : i32
    return %c0_i32, %c0_i32_0 : i32, i32
  }
  func.func @transform_4(%arg0: i32) -> (i32, i32) {
    %c0_i32 = arith.constant 0 : i32
    %c0_i32_0 = arith.constant 0 : i32
    %c0_i32_1 = arith.constant 0 : i32
    return %c0_i32, %c0_i32_0 : i32, i32
  }
  func.func @transform_5(%arg0: i32) -> (i32, i32) {
    %c0_i32 = arith.constant 0 : i32
    %c0_i32_0 = arith.constant 0 : i32
    %c0_i32_1 = arith.constant 0 : i32
    return %c0_i32, %c0_i32_0 : i32, i32
  }
  func.func @transform_6(%arg0: i32) -> (i32, i32, i32) {
    %c0_i32 = arith.constant 0 : i32
    %c0_i32_0 = arith.constant 0 : i32
    %c0_i32_1 = arith.constant 0 : i32
    %c0_i32_2 = arith.constant 0 : i32
    return %c0_i32, %c0_i32_0, %c0_i32_1 : i32, i32, i32
  }
  func.func @transform_7(%arg0: i32) -> (i32, i32, i32) {
    %c0_i32 = arith.constant 0 : i32
    %c0_i32_0 = arith.constant 0 : i32
    %c0_i32_1 = arith.constant 0 : i32
    return %arg0, %c0_i32, %c0_i32_0 : i32, i32, i32
  }
}

</mosaic_0001>

<bundles_post_ra>
// kernel: tpu_custom_call.1
= control target key start
LH: loop header
LB: loop body
LE: loop exit
PB: predicated region body
PF: predicated region fallthrough
CT: control target
= control target key end

     0   :  { %s3746_s0 = inlined_call_operand.hbm [shape: f32[4,32,256], index: 0, kind: input, shape index: {}]   ;;  %s3747_s1 = inlined_call_operand.vmem [shape: f32[32,1], index: 1, kind: input, shape index: {}]   ;;  %s3748_s2 = inlined_call_operand.vmem [shape: f32[32,1], index: 2, kind: input, shape index: {}]   ;;  %s3749_s3 = inlined_call_operand.vmem [shape: f32[32,288], index: 3, kind: input, shape index: {}]   ;;  %s3750_s4 = inlined_call_operand.vmem [shape: f32[32,1], index: 4, kind: input, shape index: {}]   ;;  %s3751_s5 = inlined_call_operand.hbm [shape: f32[32,32], index: 5, kind: input, shape index: {}]   ;;  %s3752_s6 = inlined_call_operand.hbm [shape: f32[9,1,256], index: 6, kind: input, shape index: {}]   ;;  %s3753_s7 = inlined_call_operand.hbm [shape: f32[4,32,256], index: 7, kind: output, shape index: {}]  }
   0x1   :  { %3754 = sst [smem:[#allocation13_spill]] %s3751_s5 }
   0x2   :  { %12 = vsyncpa [#allocation4], 0 }
   0x3   :  { %14 = vsyncpa [#allocation4 + $0x1], 0 }
   0x4   :  { %15 = vsyncpa [#allocation7], 0 }
   0x5   :  { %16 = vsyncpa [#allocation5], 0 }
   0x6   :  { %18 = vsyncpa [#allocation5 + $0x1], 0  ;;  %s2498_s24 = smov 0   ;;  %s2500_s25 = smov 0  }
   0x7   :  { %s2502_s26 = smov 0   ;;  %s2504_s27 = smov 0  }
   0x8 LB: > { %s2519_s28 = sadd.s32 4294967295, %s2438_s27   ;;  %s2112_s29 = sadd.s32 4294967294, %s2438_s27   ;;  %s2438_s27 = sphi %s2504_s27, %s3765_s27   ;;  %s2434_s26 = sphi %s2502_s26, %s3764_s26   ;;  %s2430_s25 = sphi %s2500_s25, %s3763_s25   ;;  %s2426_s24 = sphi %s2498_s24, %s3762_s24  }
   0x9   : > { %p44_p0 = scmp.ne.s32.totalorder %s2430_s25, %s2426_s24  ;;  %p45_p1 = scmp.eq.s32.totalorder %s2519_s28, 0 }
   0xa   : > { %p194_p2 = scmp.eq.s32.totalorder %s2519_s28, 1  ;;  %p200_p3 = scmp.eq.s32.totalorder %s2112_s29, 1 }
   0xb   : > { %p2528_p4 = por %p45_p1, %p44_p0  ;;  %p2113_p5 = scmp.ge.s32.totalorder %s2438_s27, 1 }
   0xc   : > { %p2533_p6 = por %p200_p3, %p44_p0  ;;  %p207_p7 = scmp.lt.s32.totalorder %s2438_s27, 3 }
   0xd   : > { %s3757_s5 = sld [smem:[#allocation13_spill]]  ;;  %s2440_s13 = smov [#allocation6]  }
   0xe   : > { %p2541_p8 = pnand %p2113_p5, %p207_p7  ;;  %s232_s14 = sshll.u32 %s2440_s13, 4  ;;  %s233_s14 = int_to_ptr.vmem [resolvable:$true] %s232_s14 }
   0xf   : > { %s244_s17 = sshll.u32 %s3752_s6, 4  ;;  %s2441_s18 = smov 128   ;;  %s245_s17 = int_to_ptr.hbm [resolvable:$true] %s244_s17 }
  0x10   : > { %p2204_p9 = pneg %p2541_p8  ;;  %s2442_s19 = smov 8  }
  0x11   : > { %s2443_s20 = smov [#allocation8]   ;;  %s2444_s22 = smov 32  }
  0x12   : > { %p2205_p10 = pnand %p2204_p9, %p45_p1  ;;  %s246_s21 = sshll.u32 %s2443_s20, 4  ;;  %s247_s21 = int_to_ptr.vmem [resolvable:$true] %s246_s21 }
  0x13   : > { %s230_s11 = sshll.u32 %s3757_s5, 4  ;;  %s2445_s23 = smov 2   ;;  %s231_s11 = int_to_ptr.hbm [resolvable:$true] %s230_s11 }
  0x14   : > { %2207 = dma.hbm_to_vmem [thread:$0]  (!%p2205_p10), %s231_s11, 512, %s233_s14, [#allocation7], %s2441_s18, %s2441_s18, %s2442_s19  }
  0x15   : > { %2210 = dma.hbm_to_vmem [thread:$0]  (!%p2205_p10), %s245_s17, 288, %s247_s21, [#allocation7], %s2444_s22, %s2444_s22, %s2445_s23  }
  0x16   : > { %s2554_s29 = sadd.s32 1, %s2438_s27   ;;  %s31_s10 = sadd.s32 1, %s2434_s26 }
  0x17   : > { %s28_s9 = ssub.s32 %s2438_s27, %s2554_s29  ;;  %p38_p13 = scmp.ne.s32.totalorder %s2434_s26, %s2430_s25 }
  0x18   : > { %p29_p12 = scmp.eq.s32.totalorder %s28_s9, 0  ;;  %p39_p0 = scmp.eq.s32.totalorder %s2438_s27, 0 }
  0x19   : > { %p2567_p5 = por %p194_p2, %p38_p13  ;;  %p2221_p7 = scmp.lt.s32.totalorder %s2438_s27, 2 }
  0x1a   : > { %s2563_s13 = scalar_select %p29_p12, %s2434_s26, %s31_s10  }
  0x1b   : > { %p40_p3 = por %p39_p0, %p38_p13  ;;  %s260_s14 = sand.u32 1, %s2434_s26  }
  0x1c   : > { %s2117_s15 = sshll.u32 %s260_s14, 7  ;;  %s2189_s16 = sshll.u32 %s2438_s27, 7 }
  0x1d   : > { %s270_s19 = scalar_lea.hbm %s3746_s0, %s2189_s16  ;;  %s264_s20 = scalar_lea.vmem [#allocation3], %s2117_s15 }
  0x1e   : > { %s273_s21 = sshll.u32 %s264_s20, 4  ;;  %s271_s22 = sshll.u32 %s270_s19, 4  ;;  %s274_s21 = int_to_ptr.vmem [resolvable:$true] %s273_s21  ;;  %s272_s22 = int_to_ptr.hbm [resolvable:$true] %s271_s22 }
  0x1f   : > { %p2577_p9 = pnand %p2221_p7, %p40_p3  ;;  %s261_s9 = scalar_lea.sflag [#allocation4], %s260_s14 }
  0x20   : > { %s2338_s10 = sshra.s32 %s272_s22, 4  ;;  %s2345_s17 = scalar_lea.hbm %s3746_s0, 256  ;;  %s2339_s10 = int_to_ptr.hbm [resolvable:$true] %s2338_s10 }
  0x21   : > { %s2340_s5 = scalar_lea.hbm %s2339_s10, 128  ;;  %p2342_p10 = pneg %p2577_p9 }
  0x22   : > { %p2341_p2 = scmp.ne.s32.totalorder %s2339_s10, %s2340_s5  ;;  %p2346_p0 = scmp.lt.s32.totalorder %s2339_s10, %s3746_s0 }
  0x23   : > { %p2347_p3 = scmp.lt.s32.totalorder %s2345_s17, %s2340_s5 }
  0x24   : > { %p2343_p12 = pnand %p2342_p10, %p2341_p2 }
  0x25   : > { %p2348_p7 = por %p2347_p3, %p2346_p0 }
  0x26   : > { %p2344_p13 = pneg %p2343_p12 }
  0x28   : > { %p2349_p11 = pnand %p2348_p7, %p2344_p13 }
  0x2a   : > { %2352 = shalt.err (!%p2349_p11)
}
  0x2b   : > { %s2446_s14 = smov 256   ;;  %s2447_s20 = smov 16  }
  0x2c   : > { %2214 = dma.hbm_to_vmem [thread:$0]  (!%p2577_p9), %s272_s22, 2048, %s274_s21, %s261_s9, %s2446_s14, %s2446_s14, %s2447_s20  }
  0x2d   : > { %285 = sbr.rel (%p2541_p8) target bundleno = 975 (0x3cf), region = 48  ;;  %s2594_s16 = sand.u32 (!%p2541_p8), 1, %s2430_s25  }
  0x2e   : > { %s2122_s10 = sshll.u32 (!%p2541_p8), %s2594_s16, 7  ;;  %s288_s5 = scalar_lea.sflag (!%p2541_p8), [#allocation4], %s2594_s16 }
  0x2f   : > { %s2600_s15 = scalar_lea.vmem (!%p2541_p8), [#allocation3], %s2122_s10 }
  0x32   : > { %2413 = dma.done.wait (%p2528_p4), %s288_s5, 2048  }
  0x33   : > { %2415 = vsyncadd (%p2528_p4), %s288_s5, 4294965248 }
  0x34   : > { %2417 = dma.done.wait (%p45_p1), [#allocation7], 800  }
  0x35   : > { %2419 = vsyncadd (%p45_p1), [#allocation7], 4294966496  ;;  %v2448_v0 = vmov 0   ;;  %v378_v1 = vld [vmem:[%s3748_s2 + $0x18] sm:$0xff]  ;;  %v377_v3 = vld [vmem:[%s3748_s2 + $0x10] sm:$0xff]  ;;  %s2449_s30 = smov 1  }
  0x36   : > { %2276 = vset.pattern.permute.xlu1 %v2448_v0  ;;  %2275 = vset.pattern.permute.xlu0 %v2448_v0  ;;  %v346_v2 = vld [vmem:[%s3747_s1 + $0x18] sm:$0xff]  ;;  %v345_v4 = vld [vmem:[%s3747_s1 + $0x10] sm:$0xff]  ;;  %v344_v5 = vld [vmem:[%s3747_s1 + $0x8] sm:$0xff]  ;;  %s2450_s9 = smov 112   ;;  %s2451_s17 = smov 15   ;;  %vm1445_vm8 = vcmask 261120  }
  0x37   : > { %2277 = vset.pattern.permute.xlu2 %v2448_v0  ;;  %396 = vperm.xlu1 %2276, %v378_v1   ;;  %v343_v6 = vld [vmem:[%s3747_s1] sm:$0xff]  ;;  %v376_v7 = vld [vmem:[%s3748_s2 + $0x8] sm:$0xff]  ;;  %v341_v9 = vld [vmem:[%s2600_s15 + $0x30] sm:$0xff]  ;;  %s2452_s18 = smov 113   ;;  %s2453_s19 = smov 16  }
  0x38   : > { %364 = vperm.xlu0 %2275, %v346_v2   ;;  %391 = vperm.xlu2 %2277, %v377_v3   ;;  %v375_v8 = vld [vmem:[%s3748_s2] sm:$0xff]  ;;  %v342_v10 = vld [vmem:[%s2600_s15 + $0x38] sm:$0xff]  ;;  %v340_v21 = vld [vmem:[%s2600_s15 + $0x28] sm:$0xff]  ;;  %s2454_s14 = smov 127   ;;  %s2455_s20 = smov 17  }
  0x39   : > { %v339_v20 = vld [vmem:[%s2600_s15 + $0x20] sm:$0xff]  ;;  %v337_v29 = vld [vmem:[%s2600_s15 + $0x10] sm:$0xff]  ;;  %v338_v30 = vld [vmem:[%s2600_s15 + $0x18] sm:$0xff]  ;;  %s2456_s5 = smov 111   ;;  %s3678_s23 = scalar_lea.vmem [#allocation9], %s2122_s10 }
  0x3a   : > { %v335_v40 = vld [vmem:[%s2600_s15] sm:$0xff]  ;;  %v336_v41 = vld [vmem:[%s2600_s15 + $0x8] sm:$0xff]  ;;  %v2133_v42 = vld [vmem:[%s2600_s15 + $0x78] sm:$0xff]  ;;  %s2191_s10 = sshll.u32 %s2519_s28, 7  ;;  %s2004_s12 = scalar_lea.sflag [#allocation5], %s2594_s16 }
  0x3b   : > { %v2130_v53 = vld [vmem:[%s2600_s15 + $0x60] sm:$0xff]  ;;  %v2131_v54 = vld [vmem:[%s2600_s15 + $0x68] sm:$0xff]  ;;  %s2388_s22 = scalar_lea.hbm %s3753_s7, 256 }
  0x3f   : > { %354 = vperm.xlu1 %2276, %v344_v5  }
  0x40   : > { %359 = vperm.xlu0 %2275, %v345_v4   ;;  %349 = vperm.xlu2 %2277, %v343_v6  }
  0x47   : > { %381 = vperm.xlu1 %2276, %v375_v8  }
  0x48   : > { %386 = vperm.xlu0 %2275, %v376_v7   ;;  %838 = vperm.xlu2 %2277, %v346_v2   ;;  %v431_v2 = vlaneseq }
  0x4f   : > { %870 = vperm.xlu1 %2276, %v378_v1  }
  0x50   : > { %833 = vperm.xlu0 %2275, %v345_v4   ;;  %828 = vperm.xlu2 %2277, %v344_v5   ;;  %v2759_v4 = vand.u32 127, %v431_v2  ;;  %v586_v5 = vld [vmem:[#allocation8 + $0x6] sm:$0x3] }
  0x52   : > { %vm576_vm0 = vcmp.lt.s32.totalorder %v2759_v4, 1  ;;  %vm728_vm1 = vcmp.lt.s32.totalorder %v2759_v4, 112  ;;  %vm528_vm2 = vcmp.lt.s32.totalorder %v2759_v4, 15  ;;  %vm680_vm3 = vcmp.lt.s32.totalorder %v2759_v4, 113 }
  0x53   : > { %vm480_vm4 = vcmp.lt.s32.totalorder %v2759_v4, 16  ;;  %vm632_vm5 = vcmp.lt.s32.totalorder %v2759_v4, 127  ;;  %vm433_vm6 = vcmp.lt.s32.totalorder %v2759_v4, 17  ;;  %vm776_vm7 = vcmp.lt.s32.totalorder %v2759_v4, 111 }
  0x57   : > { %823 = vperm.xlu1 %2276, %v343_v6  }
  0x58   : > { %865 = vperm.xlu0 %2275, %v377_v3   ;;  %860 = vperm.xlu2 %2277, %v376_v7   ;;  %v588_v7 = vperm.slane %v586_v5, 0 }
  0x60   : > { %855 = vperm.xlu0 %2275, %v375_v8   ;;  %v589_v8 = vperm.slane %v586_v5, 1 }
  0x92   : > { %v392_v15 = vpop.permute.xlu2 %391 }
  0x9a   : > { %v350_v28 = vpop.permute.xlu2 %349 }
  0x9b   : > { %v367_v45 = vmul.f32 %v350_v28, %v335_v40  ;;  %v368_v46 = vmul.f32 %v350_v28, %v336_v41 }
  0xa2   : > { %v2665_v44 = vpop.permute.xlu2 %838 }
  0xa3   : > { %v848_v47 = vmul.f32 %v2133_v42, %v2665_v44 }
  0xa9   : > { %v397_v11 = vpop.permute.xlu1 %396 }
  0xaa   : > { %v365_v12 = vpop.permute.xlu0 %364  ;;  %v2729_v62 = vpop.permute.xlu2 %828 }
  0xab   : > { %v373_v13 = vmul.f32 %v365_v12, %v341_v9  ;;  %v374_v14 = vmul.f32 %v365_v12, %v342_v10 }
  0xad   : > { %v405_v16 = vadd.f32 %v397_v11, %v373_v13  ;;  %v406_v17 = vadd.f32 %v397_v11, %v374_v14 }
  0xaf   : > { %v2636_v18 = vmax.f32 %v405_v16, 0.0  ;;  %v2638_v19 = vmax.f32 %v406_v17, 0.0 }
  0xb1   : > { %574 = vrot.lane.b32.xlu2 %v2638_v19, %s2449_s30  ;;  %566 = vrot.lane.b32.xlu1 %v2636_v18, %s2449_s30  ;;  %v355_v23 = vpop.permute.xlu1 %354 }
  0xb2   : > { %v360_v22 = vpop.permute.xlu0 %359  ;;  %v369_v33 = vmul.f32 %v355_v23, %v337_v29  ;;  %v370_v34 = vmul.f32 %v355_v23, %v338_v30  ;;  %v2739_v63 = vpop.permute.xlu2 %860 }
  0xb3   : > { %v371_v24 = vmul.f32 %v360_v22, %v339_v20  ;;  %v372_v25 = vmul.f32 %v360_v22, %v340_v21 }
  0xb5   : > { %v403_v26 = vadd.f32 %v392_v15, %v371_v24  ;;  %v404_v27 = vadd.f32 %v392_v15, %v372_v25  ;;  %v738_v24 = vld [vmem:[#allocation8 + $0xe] sm:$0x3] }
  0xb7   : > { %v2648_v31 = vmax.f32 %v403_v26, 0.0  ;;  %v2650_v32 = vmax.f32 %v404_v27, 0.0  ;;  %v2791_v26 = vperm.slane %v738_v24, 0  ;;  %v2793_v27 = vperm.slane %v738_v24, 1 }
  0xb9   : > { %572 = vrot.lane.b32.xlu1 %v2650_v32, %s2449_s30  ;;  %564 = vrot.lane.b32.xlu0 %v2648_v31, %s2449_s30  ;;  %v382_v36 = vpop.permute.xlu1 %381 }
  0xba   : > { %v387_v35 = vpop.permute.xlu0 %386  ;;  %v399_v50 = vadd.f32 %v382_v36, %v367_v45  ;;  %v400_v51 = vadd.f32 %v382_v36, %v368_v46 }
  0xbb   : > { %v401_v37 = vadd.f32 %v387_v35, %v369_v33  ;;  %v402_v38 = vadd.f32 %v387_v35, %v370_v34 }
  0xbc   : > { %v2679_v55 = vmax.f32 %v399_v50, 0.0  ;;  %v2681_v56 = vmax.f32 %v400_v51, 0.0  ;;  %v538_v51 = vld [vmem:[#allocation8 + $0x4] sm:$0x3] }
  0xbd   : > { %v2656_v39 = vmax.f32 %v401_v37, 0.0  ;;  %v2661_v43 = vmax.f32 %v402_v38, 0.0 }
  0xbf   : > { %562 = vrot.lane.b32.xlu2 %v2656_v39, %s2449_s30 }
  0xc1   : > { %718 = vrot.lane.b32.xlu1 %v2636_v18, %s2450_s9  ;;  %570 = vrot.lane.b32.xlu0 %v2661_v43, %s2449_s30  ;;  %v2672_v49 = vpop.permute.xlu1 %870 }
  0xc2   : > { %v834_v48 = vpop.permute.xlu0 %833  ;;  %v2675_v52 = vadd.f32 %v2672_v49, %v848_v47 }
  0xc3   : > { %v845_v57 = vmul.f32 %v2130_v53, %v834_v48  ;;  %v846_v58 = vmul.f32 %v2131_v54, %v834_v48  ;;  %v2824_v54 = vperm.slane %v538_v51, 0 }
  0xc7   : > { %726 = vrot.lane.b32.xlu2 %v2638_v19, %s2450_s9 }
  0xc9   : > { %568 = vrot.lane.b32.xlu1 %v2681_v56, %s2449_s30  ;;  %560 = vrot.lane.b32.xlu0 %v2679_v55, %s2449_s30  ;;  %v2757_v3 = vpop.permute.xlu1 %823 }
  0xca   : > { %v866_v59 = vpop.permute.xlu0 %865 }
  0xcb   : > { %v2689_v60 = vadd.f32 %v866_v59, %v845_v57  ;;  %v2691_v61 = vadd.f32 %v866_v59, %v846_v58  ;;  %v2826_v57 = vperm.slane %v538_v51, 1 }
  0xcf   : > { %716 = vrot.lane.b32.xlu2 %v2648_v31, %s2450_s9 }
  0xd1   : > { %518 = vrot.lane.b32.xlu1 %v2636_v18, %s2451_s17  ;;  %724 = vrot.lane.b32.xlu0 %v2650_v32, %s2450_s9 }
  0xd2   : > { %v2768_v9 = vpop.permute.xlu0 %855 }
  0xd7   : > { %526 = vrot.lane.b32.xlu2 %v2638_v19, %s2451_s17 }
  0xd9   : > { %722 = vrot.lane.b32.xlu1 %v2661_v43, %s2450_s9  ;;  %714 = vrot.lane.b32.xlu0 %v2656_v39, %s2450_s9 }
  0xdf   : > { %516 = vrot.lane.b32.xlu2 %v2648_v31, %s2451_s17 }
  0xe1   : > { %712 = vrot.lane.b32.xlu1 %v2679_v55, %s2450_s9  ;;  %524 = vrot.lane.b32.xlu0 %v2650_v32, %s2451_s17 }
  0xe7   : > { %720 = vrot.lane.b32.xlu2 %v2681_v56, %s2450_s9 }
  0xe9   : > { %522 = vrot.lane.b32.xlu1 %v2661_v43, %s2451_s17  ;;  %514 = vrot.lane.b32.xlu0 %v2656_v39, %s2451_s17 }
  0xef   : > { %670 = vrot.lane.b32.xlu2 %v2636_v18, %s2452_s18 }
  0xf1   : > { %512 = vrot.lane.b32.xlu1 %v2679_v55, %s2451_s17  ;;  %678 = vrot.lane.b32.xlu0 %v2638_v19, %s2452_s18 }
  0xf7   : > { %520 = vrot.lane.b32.xlu2 %v2681_v56, %s2451_s17 }
  0xf9   : > { %676 = vrot.lane.b32.xlu1 %v2650_v32, %s2452_s18  ;;  %668 = vrot.lane.b32.xlu0 %v2648_v31, %s2452_s18 }
  0xff   : > { %470 = vrot.lane.b32.xlu2 %v2636_v18, %s2453_s19 }
 0x101   : > { %666 = vrot.lane.b32.xlu1 %v2656_v39, %s2452_s18  ;;  %478 = vrot.lane.b32.xlu0 %v2638_v19, %s2453_s19 }
 0x107   : > { %674 = vrot.lane.b32.xlu2 %v2661_v43, %s2452_s18 }
 0x109   : > { %476 = vrot.lane.b32.xlu1 %v2650_v32, %s2453_s19  ;;  %468 = vrot.lane.b32.xlu0 %v2648_v31, %s2453_s19 }
 0x10b   : > { %v575_v0 = vpop.permute.xlu2 %574 }
 0x10f   : > { %664 = vrot.lane.b32.xlu2 %v2679_v55, %s2452_s18 }
 0x111   : > { %466 = vrot.lane.b32.xlu1 %v2656_v39, %s2453_s19  ;;  %672 = vrot.lane.b32.xlu0 %v2681_v56, %s2452_s18 }
 0x117   : > { %474 = vrot.lane.b32.xlu2 %v2661_v43, %s2453_s19 }
 0x119   : > { %v563_v1 = vpop.permute.xlu2 %562  ;;  %630 = vrot.lane.b32.xlu1 %v2638_v19, %s2454_s14  ;;  %622 = vrot.lane.b32.xlu0 %v2636_v18, %s2454_s14 }
 0x11f   : > { %464 = vrot.lane.b32.xlu2 %v2679_v55, %s2453_s19 }
 0x121   : > { %v727_v6 = vpop.permute.xlu2 %726  ;;  %620 = vrot.lane.b32.xlu1 %v2648_v31, %s2454_s14  ;;  %472 = vrot.lane.b32.xlu0 %v2681_v56, %s2453_s19 }
 0x123   : > { %v567_v10 = vpop.permute.xlu1 %566 }
 0x124   : > { %v584_v11 = vsel %vm576_vm0, %v575_v0, %v567_v10  ;;  %v580_v12 = vsel %vm576_vm0, %v567_v10, %v575_v0  ;;  %v2132_v10 = vld [vmem:[%s2600_s15 + $0x70] sm:$0xff] }
 0x125   : > { %v598_v13 = vmul.f32 %v588_v7, %v584_v11  ;;  %v599_v14 = vmul.f32 %v589_v8, %v580_v12  ;;  %v847_v12 = vmul.f32 %v2132_v10, %v2665_v44 }
 0x127   : > { %1458 = vmatpush.msra.mxu0 %v598_v13  ;;  %1545 = vmatpush.msra.mxu3 %v599_v14  ;;  %v879_v14 = vadd.f32 %v2672_v49, %v847_v12 }
 0x128   : > { %628 = vrot.lane.b32.xlu2 %v2650_v32, %s2454_s14 }
 0x129   : > { %v717_v15 = vpop.permute.xlu2 %716  ;;  %429 = vrot.lane.b32.xlu1 %v2638_v19, %s2455_s20  ;;  %421 = vrot.lane.b32.xlu0 %v2636_v18, %s2455_s20 }
 0x12b   : > { %v573_v16 = vpop.permute.xlu1 %572  ;;  %v565_v17 = vpop.permute.xlu0 %564 }
 0x12c   : > { %v579_v20 = vsel %vm576_vm0, %v565_v17, %v573_v16  ;;  %v583_v21 = vsel %vm576_vm0, %v573_v16, %v565_v17 }
 0x12d   : > { %v596_v22 = vmul.f32 %v588_v7, %v583_v21  ;;  %v597_v23 = vmul.f32 %v589_v8, %v579_v20 }
 0x12f   : > { %1459 = vmatpush.msra.mxu0 %v596_v22  ;;  %1546 = vmatpush.msra.mxu3 %v597_v23  ;;  %v2859_v22 = vmax.f32 %v879_v14, 0.0 }
 0x130   : > { %618 = vrot.lane.b32.xlu2 %v2656_v39, %s2454_s14 }
 0x131   : > { %v527_v25 = vpop.permute.xlu2 %526  ;;  %419 = vrot.lane.b32.xlu1 %v2648_v31, %s2455_s20  ;;  %626 = vrot.lane.b32.xlu0 %v2661_v43, %s2454_s14 }
 0x133   : > { %v719_v28 = vpop.permute.xlu1 %718  ;;  %v571_v29 = vpop.permute.xlu0 %570 }
 0x134   : > { %v736_v30 = vsel %vm728_vm1, %v727_v6, %v719_v28  ;;  %v578_v33 = vsel %vm576_vm0, %v563_v1, %v571_v29  ;;  %v582_v34 = vsel %vm576_vm0, %v571_v29, %v563_v1  ;;  %v732_v35 = vsel %vm728_vm1, %v719_v28, %v727_v6 }
 0x135   : > { %v594_v36 = vmul.f32 %v588_v7, %v582_v34  ;;  %v750_v37 = vmul.f32 %v2791_v26, %v732_v35  ;;  %v595_v38 = vmul.f32 %v589_v8, %v578_v33  ;;  %v2805_v40 = vmul.f32 %v2793_v27, %v736_v30 }
 0x137   : > { %1460 = vmatpush.msra.mxu0 %v594_v36  ;;  %1487 = vmatpush.msra.mxu1 %v750_v37  ;;  %v2879_v36 = vmax.f32 %v2675_v52, 0.0 }
 0x138   : > { %1547 = vmatpush.msra.mxu3 %v595_v38  ;;  %427 = vrot.lane.b32.xlu2 %v2650_v32, %s2455_s20 }
 0x139   : > { %v517_v41 = vpop.permute.xlu2 %516  ;;  %624 = vrot.lane.b32.xlu1 %v2681_v56, %s2454_s14  ;;  %616 = vrot.lane.b32.xlu0 %v2679_v55, %s2454_s14 }
 0x13b   : > { %v569_v42 = vpop.permute.xlu1 %568  ;;  %v561_v45 = vpop.permute.xlu0 %560 }
 0x13c   : > { %v577_v46 = vsel %vm576_vm0, %v561_v45, %v569_v42  ;;  %v581_v47 = vsel %vm576_vm0, %v569_v42, %v561_v45 }
 0x13d   : > { %v592_v48 = vmul.f32 %v588_v7, %v581_v47  ;;  %v593_v50 = vmul.f32 %v589_v8, %v577_v46  ;;  %v2899_v46 = vmax.f32 %v2689_v60, 0.0  ;;  %v690_v47 = vld [vmem:[#allocation8 + $0xc] sm:$0x3] }
 0x13e   : > { %v2911_v60 = vperm.slane %v690_v47, 0  ;;  %v2913_v51 = vperm.slane %v690_v47, 1 }
 0x13f   : > { %1461 = vmatpush.msra.mxu0 %v592_v48  ;;  %1548 = vmatpush.msra.mxu3 %v593_v50  ;;  %v2902_v48 = vmax.f32 %v2691_v61, 0.0  ;;  %v2128_v61 = vld [vmem:[%s2600_s15 + $0x50] sm:$0xff] }
 0x140   : > { %417 = vrot.lane.b32.xlu2 %v2656_v39, %s2455_s20  ;;  %v843_v12 = vmul.f32 %v2128_v61, %v2729_v62 }
 0x141   : > { %v721_v53 = vpop.permute.xlu2 %720  ;;  %415 = vrot.lane.b32.xlu1 %v2679_v55, %s2455_s20  ;;  %425 = vrot.lane.b32.xlu0 %v2661_v43, %s2455_s20 }
 0x143   : > { %v519_v58 = vpop.permute.xlu1 %518  ;;  %v725_v59 = vpop.permute.xlu0 %724 }
 0x144   : > { %v532_v0 = vsel %vm528_vm2, %v519_v58, %v527_v25  ;;  %v536_v1 = vsel %vm528_vm2, %v527_v25, %v519_v58  ;;  %v731_v2 = vsel %vm728_vm1, %v717_v15, %v725_v59  ;;  %v735_v5 = vsel %vm728_vm1, %v725_v59, %v717_v15  ;;  %v2129_v59 = vld [vmem:[%s2600_s15 + $0x58] sm:$0xff] }
 0x145   : > { %v550_v6 = vmul.f32 %v2824_v54, %v536_v1  ;;  %v748_v7 = vmul.f32 %v2791_v26, %v731_v2  ;;  %v551_v8 = vmul.f32 %v2826_v57, %v532_v0  ;;  %v2841_v11 = vmul.f32 %v2793_v27, %v735_v5 }
 0x146   : > { %v844_v14 = vmul.f32 %v2129_v59, %v2729_v62 }
 0x147   : > { %1462 = vmatpush.msra.mxu0 %v550_v6  ;;  %1488 = vmatpush.msra.mxu1 %v748_v7 }
 0x148   : > { %423 = vrot.lane.b32.xlu2 %v2681_v56, %s2455_s20  ;;  %1549 = vmatpush.msra.mxu3 %v551_v8 }
 0x149   : > { %v671_v13 = vpop.permute.xlu2 %670  ;;  %774 = vrot.lane.b32.xlu1 %v2638_v19, %s2456_s5  ;;  %766 = vrot.lane.b32.xlu0 %v2636_v18, %s2456_s5 }
 0x14b   : > { %v723_v15 = vpop.permute.xlu1 %722  ;;  %v715_v16 = vpop.permute.xlu0 %714 }
 0x14c   : > { %v730_v17 = vsel %vm728_vm1, %v715_v16, %v723_v15  ;;  %v734_v20 = vsel %vm728_vm1, %v723_v15, %v715_v16 }
 0x14d   : > { %v746_v44 = vmul.f32 %v2791_v26, %v730_v17  ;;  %v2857_v21 = vmul.f32 %v2793_v27, %v734_v20  ;;  %v2126_v20 = vld [vmem:[%s2600_s15 + $0x40] sm:$0xff] }
 0x14f   : > { %1489 = vmatpush.msra.mxu1 %v746_v44 }
 0x150   : > { %764 = vrot.lane.b32.xlu2 %v2648_v31, %s2456_s5 }
 0x151   : > { %v521_v49 = vpop.permute.xlu2 %520  ;;  %1179 = vrot.lane.b32.xlu1 %v2859_v22, %s2450_s9  ;;  %772 = vrot.lane.b32.xlu0 %v2650_v32, %s2456_s5 }
 0x153   : > { %v713_v23 = vpop.permute.xlu1 %712  ;;  %v525_v24 = vpop.permute.xlu0 %524 }
 0x154   : > { %v729_v25 = vsel %vm728_vm1, %v713_v23, %v721_v53  ;;  %v733_v28 = vsel %vm728_vm1, %v721_v53, %v713_v23  ;;  %v531_v29 = vsel %vm528_vm2, %v517_v41, %v525_v24  ;;  %v535_v30 = vsel %vm528_vm2, %v525_v24, %v517_v41  ;;  %v2127_v24 = vld [vmem:[%s2600_s15 + $0x48] sm:$0xff] }
 0x155   : > { %v548_v33 = vmul.f32 %v2824_v54, %v535_v30  ;;  %v744_v34 = vmul.f32 %v2791_v26, %v729_v25  ;;  %v549_v35 = vmul.f32 %v2826_v57, %v531_v29  ;;  %v2882_v37 = vmul.f32 %v2793_v27, %v733_v28  ;;  %v490_v25 = vld [vmem:[#allocation8 + $0x2] sm:$0x3] }
 0x156   : > { %v842_v29 = vmul.f32 %v2127_v24, %v2757_v3 }
 0x157   : > { %1463 = vmatpush.msra.mxu0 %v548_v33  ;;  %1490 = vmatpush.msra.mxu1 %v744_v34  ;;  %v2966_v33 = vperm.slane %v490_v25, 0  ;;  %v2968_v34 = vperm.slane %v490_v25, 1 }
 0x158   : > { %1187 = vrot.lane.b32.xlu2 %v2879_v36, %s2450_s9  ;;  %1550 = vmatpush.msra.mxu3 %v549_v35 }
 0x159   : > { %v2886_v38 = vpop.permute.xlu2 %470  ;;  %770 = vrot.lane.b32.xlu1 %v2661_v43, %s2456_s5  ;;  %762 = vrot.lane.b32.xlu0 %v2656_v39, %s2456_s5 }
 0x15b   : > { %v523_v26 = vpop.permute.xlu1 %522  ;;  %v515_v52 = vpop.permute.xlu0 %514 }
 0x15c   : > { %v530_v27 = vsel %vm528_vm2, %v515_v52, %v523_v26  ;;  %v534_v41 = vsel %vm528_vm2, %v523_v26, %v515_v52  ;;  %v874_v26 = vadd.f32 %v2768_v9, %v842_v29 }
 0x15d   : > { %v546_v42 = vmul.f32 %v2824_v54, %v534_v41  ;;  %v547_v45 = vmul.f32 %v2826_v57, %v530_v27 }
 0x15f   : > { %1464 = vmatpush.msra.mxu0 %v546_v42  ;;  %1551 = vmatpush.msra.mxu3 %v547_v45 }
 0x160   : > { %1177 = vrot.lane.b32.xlu2 %v2899_v46, %s2450_s9 }
 0x161   : > { %v675_v50 = vpop.permute.xlu2 %674  ;;  %760 = vrot.lane.b32.xlu1 %v2679_v55, %s2456_s5  ;;  %1185 = vrot.lane.b32.xlu0 %v2902_v48, %s2450_s9 }
 0x163   : > { %v513_v53 = vpop.permute.xlu1 %512  ;;  %v679_v58 = vpop.permute.xlu0 %678 }
 0x164   : > { %v529_v0 = vsel %vm528_vm2, %v513_v53, %v521_v49  ;;  %v533_v1 = vsel %vm528_vm2, %v521_v49, %v513_v53  ;;  %v684_v2 = vsel %vm680_vm3, %v671_v13, %v679_v58  ;;  %v688_v5 = vsel %vm680_vm3, %v679_v58, %v671_v13 }
 0x165   : > { %v544_v6 = vmul.f32 %v2824_v54, %v533_v1  ;;  %v702_v7 = vmul.f32 %v2911_v60, %v684_v2  ;;  %v545_v8 = vmul.f32 %v2826_v57, %v529_v0  ;;  %v2929_v10 = vmul.f32 %v2913_v51, %v688_v5 }
 0x166   : > { %v875_v57 = vadd.f32 %v2739_v63, %v843_v12  ;;  %v876_v13 = vadd.f32 %v2739_v63, %v844_v14  ;;  %v841_v63 = vmul.f32 %v2126_v20, %v2757_v3 }
 0x167   : > { %1465 = vmatpush.msra.mxu0 %v544_v6  ;;  %1491 = vmatpush.msra.mxu1 %v702_v7 }
 0x168   : > { %768 = vrot.lane.b32.xlu2 %v2681_v56, %s2456_s5  ;;  %1552 = vmatpush.msra.mxu3 %v545_v8  ;;  %v2952_v23 = vmax.f32 %v875_v57, 0.0  ;;  %v2955_v28 = vmax.f32 %v876_v13, 0.0  ;;  %v873_v35 = vadd.f32 %v2768_v9, %v841_v63 }
 0x169   : > { %v2935_v54 = vpop.permute.xlu2 %664  ;;  %1041 = vrot.lane.b32.xlu1 %v2879_v36, %s2449_s30  ;;  %1033 = vrot.lane.b32.xlu0 %v2859_v22, %s2449_s30 }
 0x16a   : > { %v2988_v58 = vmax.f32 %v873_v35, 0.0 }
 0x16b   : > { %v677_v62 = vpop.permute.xlu1 %676  ;;  %v669_v15 = vpop.permute.xlu0 %668 }
 0x16c   : > { %v683_v16 = vsel %vm680_vm3, %v669_v15, %v677_v62  ;;  %v687_v17 = vsel %vm680_vm3, %v677_v62, %v669_v15 }
 0x16d   : > { %v700_v44 = vmul.f32 %v2911_v60, %v683_v16  ;;  %v2950_v49 = vmul.f32 %v2913_v51, %v687_v17 }
 0x16f   : > { %1492 = vmatpush.msra.mxu1 %v700_v44  ;;  %v642_v44 = vld [vmem:[#allocation8 + $0xa] sm:$0x3] }
 0x170   : > { %1175 = vrot.lane.b32.xlu2 %v2952_v23, %s2450_s9 }
 0x171   : > { %v475_v30 = vpop.permute.xlu2 %474  ;;  %1031 = vrot.lane.b32.xlu1 %v2899_v46, %s2449_s30  ;;  %1183 = vrot.lane.b32.xlu0 %v2955_v28, %s2450_s9 }
 0x173   : > { %v667_v52 = vpop.permute.xlu1 %666  ;;  %v479_v27 = vpop.permute.xlu0 %478 }
 0x174   : > { %v682_v3 = vsel %vm680_vm3, %v667_v52, %v675_v50  ;;  %v686_v41 = vsel %vm680_vm3, %v675_v50, %v667_v52  ;;  %v484_v42 = vsel %vm480_vm4, %v2886_v38, %v479_v27  ;;  %v488_v45 = vsel %vm480_vm4, %v479_v27, %v2886_v38 }
 0x175   : > { %v502_v47 = vmul.f32 %v2966_v33, %v488_v45  ;;  %v698_v9 = vmul.f32 %v2911_v60, %v682_v3  ;;  %v503_v61 = vmul.f32 %v2968_v34, %v484_v42  ;;  %v2986_v53 = vmul.f32 %v2913_v51, %v686_v41 }
 0x176   : > { %v2990_v50 = vmax.f32 %v874_v26, 0.0 }
 0x177   : > { %1466 = vmatpush.msra.mxu0 %v502_v47  ;;  %1493 = vmatpush.msra.mxu1 %v698_v9 }
 0x178   : > { %1039 = vrot.lane.b32.xlu2 %v2902_v48, %s2449_s30  ;;  %1553 = vmatpush.msra.mxu3 %v503_v61 }
 0x179   : > { %v465_v38 = vpop.permute.xlu2 %464  ;;  %1181 = vrot.lane.b32.xlu1 %v2990_v50, %s2450_s9  ;;  %1173 = vrot.lane.b32.xlu0 %v2988_v58, %s2450_s9 }
 0x17b   : > { %v477_v59 = vpop.permute.xlu1 %476  ;;  %v469_v0 = vpop.permute.xlu0 %468 }
 0x17c   : > { %v483_v1 = vsel %vm480_vm4, %v469_v0, %v477_v59  ;;  %v487_v2 = vsel %vm480_vm4, %v477_v59, %v469_v0  ;;  %v442_v0 = vld [vmem:[#allocation8] sm:$0x3] }
 0x17d   : > { %v500_v5 = vmul.f32 %v2966_v33, %v487_v2  ;;  %v501_v6 = vmul.f32 %v2968_v34, %v483_v1 }
 0x17f   : > { %1467 = vmatpush.msra.mxu0 %v500_v5  ;;  %1554 = vmatpush.msra.mxu3 %v501_v6 }
 0x180   : > { %1029 = vrot.lane.b32.xlu2 %v2952_v23, %s2449_s30 }
 0x181   : > { %1133 = vrot.lane.b32.xlu1 %v2859_v22, %s2452_s18  ;;  %1037 = vrot.lane.b32.xlu0 %v2955_v28, %s2449_s30 }
 0x182   : > { %v629_v7 = vpop.permute.xlu2 %628 }
 0x183   : > { %v467_v8 = vpop.permute.xlu1 %466  ;;  %v673_v12 = vpop.permute.xlu0 %672 }
 0x184   : > { %v482_v14 = vsel %vm480_vm4, %v467_v8, %v475_v30  ;;  %v486_v57 = vsel %vm480_vm4, %v475_v30, %v467_v8  ;;  %v681_v13 = vsel %vm680_vm3, %v2935_v54, %v673_v12  ;;  %v685_v62 = vsel %vm680_vm3, %v673_v12, %v2935_v54 }
 0x185   : > { %v498_v15 = vmul.f32 %v2966_v33, %v486_v57  ;;  %v696_v16 = vmul.f32 %v2911_v60, %v681_v13  ;;  %v499_v17 = vmul.f32 %v2968_v34, %v482_v14  ;;  %v3024_v20 = vmul.f32 %v2913_v51, %v685_v62 }
 0x186   : > { %v3033_v60 = vperm.slane %v642_v44, 0  ;;  %v3035_v54 = vperm.slane %v642_v44, 1 }
 0x187   : > { %1468 = vmatpush.msra.mxu0 %v498_v15  ;;  %1494 = vmatpush.msra.mxu1 %v696_v16 }
 0x188   : > { %1141 = vrot.lane.b32.xlu2 %v2879_v36, %s2452_s18  ;;  %1555 = vmatpush.msra.mxu3 %v499_v17 }
 0x189   : > { %1035 = vrot.lane.b32.xlu1 %v2990_v50, %s2449_s30  ;;  %1027 = vrot.lane.b32.xlu0 %v2988_v58, %s2449_s30 }
 0x18a   : > { %v619_v51 = vpop.permute.xlu2 %618 }
 0x18b   : > { %v631_v24 = vpop.permute.xlu1 %630  ;;  %v623_v25 = vpop.permute.xlu0 %622 }
 0x18c   : > { %v636_v63 = vsel %vm632_vm5, %v623_v25, %v631_v24  ;;  %v640_v29 = vsel %vm632_vm5, %v631_v24, %v623_v25 }
 0x18d   : > { %v654_v30 = vmul.f32 %v3033_v60, %v636_v63  ;;  %v3043_v35 = vmul.f32 %v3035_v54, %v640_v29 }
 0x18f   : > { %1495 = vmatpush.msra.mxu1 %v654_v30 }
 0x190   : > { %1131 = vrot.lane.b32.xlu2 %v2899_v46, %s2452_s18 }
 0x191   : > { %987 = vrot.lane.b32.xlu1 %v2859_v22, %s2451_s17  ;;  %1139 = vrot.lane.b32.xlu0 %v2902_v48, %s2452_s18 }
 0x192   : > { %v428_v26 = vpop.permute.xlu2 %427 }
 0x193   : > { %v621_v52 = vpop.permute.xlu1 %620  ;;  %v473_v27 = vpop.permute.xlu0 %472 }
 0x194   : > { %v635_v3 = vsel %vm632_vm5, %v621_v52, %v629_v7  ;;  %v639_v41 = vsel %vm632_vm5, %v629_v7, %v621_v52  ;;  %v481_v42 = vsel %vm480_vm4, %v465_v38, %v473_v27  ;;  %v485_v45 = vsel %vm480_vm4, %v473_v27, %v465_v38 }
 0x195   : > { %v496_v47 = vmul.f32 %v2966_v33, %v485_v45  ;;  %v652_v9 = vmul.f32 %v3033_v60, %v635_v3  ;;  %v497_v61 = vmul.f32 %v2968_v34, %v481_v42  ;;  %v3063_v59 = vmul.f32 %v3035_v54, %v639_v41 }
 0x196   : > { %v444_v33 = vperm.slane %v442_v0, 0  ;;  %v445_v34 = vperm.slane %v442_v0, 1 }
 0x197   : > { %1469 = vmatpush.msra.mxu0 %v496_v47  ;;  %1496 = vmatpush.msra.mxu1 %v652_v9 }
 0x198   : > { %995 = vrot.lane.b32.xlu2 %v2879_v36, %s2451_s17  ;;  %1556 = vmatpush.msra.mxu3 %v497_v61 }
 0x199   : > { %1137 = vrot.lane.b32.xlu1 %v2955_v28, %s2452_s18  ;;  %1129 = vrot.lane.b32.xlu0 %v2952_v23, %s2452_s18 }
 0x19a   : > { %v418_v38 = vpop.permute.xlu2 %417 }
 0x19b   : > { %v430_v1 = vpop.permute.xlu1 %429  ;;  %v422_v2 = vpop.permute.xlu0 %421 }
 0x19c   : > { %v437_v5 = vsel %vm433_vm6, %v422_v2, %v430_v1  ;;  %v441_v6 = vsel %vm433_vm6, %v430_v1, %v422_v2 }
 0x19d   : > { %v454_v7 = vmul.f32 %v444_v33, %v441_v6  ;;  %v455_v8 = vmul.f32 %v445_v34, %v437_v5 }
 0x19f   : > { %1470 = vmatpush.msra.mxu0 %v454_v7  ;;  %1557 = vmatpush.msra.mxu3 %v455_v8  ;;  %v1197_v7 = vld [vmem:[#allocation8 + $0xe] sm:$0x3]  ;;  %v3148_v8 = vld [vmem:[%s3749_s3] sm:$0xff] }
 0x1a0   : > { %985 = vrot.lane.b32.xlu2 %v2899_v46, %s2451_s17 }
 0x1a1   : > { %1127 = vrot.lane.b32.xlu1 %v2988_v58, %s2452_s18  ;;  %993 = vrot.lane.b32.xlu0 %v2902_v48, %s2451_s17 }
 0x1a2   : > { %v424_v12 = vpop.permute.xlu2 %423 }
 0x1a3   : > { %v420_v14 = vpop.permute.xlu1 %419  ;;  %v627_v57 = vpop.permute.xlu0 %626 }
 0x1a4   : > { %v436_v13 = vsel %vm433_vm6, %v420_v14, %v428_v26  ;;  %v440_v62 = vsel %vm433_vm6, %v428_v26, %v420_v14  ;;  %v634_v15 = vsel %vm632_vm5, %v619_v51, %v627_v57  ;;  %v638_v16 = vsel %vm632_vm5, %v627_v57, %v619_v51 }
 0x1a5   : > { %v452_v17 = vmul.f32 %v444_v33, %v440_v62  ;;  %v650_v44 = vmul.f32 %v3033_v60, %v634_v15  ;;  %v453_v24 = vmul.f32 %v445_v34, %v436_v13  ;;  %v3092_v25 = vmul.f32 %v3035_v54, %v638_v16 }
 0x1a6   : > { %v3159_v14 = vperm.slane %v1197_v7, 0 }
 0x1a7   : > { %1471 = vmatpush.msra.mxu0 %v452_v17  ;;  %1497 = vmatpush.msra.mxu1 %v650_v44 }
 0x1a8   : > { %1135 = vrot.lane.b32.xlu2 %v2990_v50, %s2452_s18  ;;  %1558 = vmatpush.msra.mxu3 %v453_v24 }
 0x1a9   : > { %991 = vrot.lane.b32.xlu1 %v2955_v28, %s2451_s17  ;;  %983 = vrot.lane.b32.xlu0 %v2952_v23, %s2451_s17 }
 0x1aa   : > { %v765_v51 = vpop.permute.xlu2 %764 }
 0x1ab   : > { %v625_v63 = vpop.permute.xlu1 %624  ;;  %v617_v29 = vpop.permute.xlu0 %616 }
 0x1ac   : > { %v633_v30 = vsel %vm632_vm5, %v617_v29, %v625_v63  ;;  %v637_v26 = vsel %vm632_vm5, %v625_v63, %v617_v29 }
 0x1ad   : > { %v648_v52 = vmul.f32 %v3033_v60, %v633_v30  ;;  %v3106_v27 = vmul.f32 %v3035_v54, %v637_v26  ;;  %v3179_v26 = vld [vmem:[%s3749_s3 + $0x8] sm:$0xff] }
 0x1af   : > { %1498 = vmatpush.msra.mxu1 %v648_v52 }
 0x1b0   : > { %1087 = vrot.lane.b32.xlu2 %v2859_v22, %s2454_s14 }
 0x1b1   : > { %981 = vrot.lane.b32.xlu1 %v2988_v58, %s2451_s17  ;;  %1095 = vrot.lane.b32.xlu0 %v2879_v36, %s2454_s14 }
 0x1b2   : > { %v1188_v3 = vpop.permute.xlu2 %1187  ;;  %1499 = vmatpush.msra.mxu1 %v2636_v18  ;;  %v786_v18 = vld [vmem:[#allocation8 + $0x10] sm:$0x3] }
 0x1b3   : > { %v416_v41 = vpop.permute.xlu1 %415  ;;  %v426_v42 = vpop.permute.xlu0 %425 }
 0x1b4   : > { %1500 = vmatpush.msra.mxu1 %v2648_v31  ;;  %v435_v60 = vsel %vm433_vm6, %v418_v38, %v426_v42  ;;  %v439_v54 = vsel %vm433_vm6, %v426_v42, %v418_v38  ;;  %v434_v45 = vsel %vm433_vm6, %v416_v41, %v424_v12  ;;  %v438_v47 = vsel %vm433_vm6, %v424_v12, %v416_v41 }
 0x1b5   : > { %v450_v9 = vmul.f32 %v444_v33, %v439_v54  ;;  %v451_v61 = vmul.f32 %v445_v34, %v435_v60  ;;  %v448_v31 = vmul.f32 %v444_v33, %v438_v47  ;;  %v449_v0 = vmul.f32 %v445_v34, %v434_v45  ;;  %v3206_v47 = vld [vmem:[%s3749_s3 + $0x20] sm:$0xff] }
 0x1b6   : > { %1501 = vmatpush.msra.mxu1 %v2656_v39  ;;  %v3133_v38 = vperm.slane %v786_v18, 0  ;;  %v3135_v39 = vperm.slane %v786_v18, 1  ;;  %v3157_v12 = vperm.slane %v1197_v7, 1 }
 0x1b7   : > { %1472 = vmatpush.msra.mxu0 %v450_v9  ;;  %1559 = vmatpush.msra.mxu3 %v451_v61  ;;  %v3213_v9 = vld [vmem:[%s3749_s3 + $0x30] sm:$0xff] }
 0x1b8   : > { %989 = vrot.lane.b32.xlu2 %v2990_v50, %s2451_s17  ;;  %1502 = vmatpush.msra.mxu1 %v2679_v55  ;;  %s2017_s17 = sshll.u32 %s3678_s23, 4  ;;  %s2018_s17 = int_to_ptr.vmem [resolvable:$true] %s2017_s17 }
 0x1b9   : > { %1093 = vrot.lane.b32.xlu1 %v2902_v48, %s2454_s14  ;;  %1085 = vrot.lane.b32.xlu0 %v2899_v46, %s2454_s14 }
 0x1ba   : > { %v3137_v1 = vpop.permute.xlu2 %1177  ;;  %1473 = vmatpush.msra.mxu0 %v448_v31  ;;  %1560 = vmatpush.msra.mxu3 %v449_v0 }
 0x1bb   : > { %v775_v2 = vpop.permute.xlu1 %774  ;;  %v767_v55 = vpop.permute.xlu0 %766  ;;  %1561 = vmatmul.f32.vlgmr.msra.gmra.mxu3 %v3148_v8  ;;  %1474 = vmatmul.f32.vlgmr.msra.gmra.mxu0 %v3148_v8 }
 0x1bc   : > { %v784_v33 = vsel %vm776_vm7, %v775_v2, %v767_v55  ;;  %v780_v34 = vsel %vm776_vm7, %v767_v55, %v775_v2  ;;  %1503 = vmatmul.f32.vlgmr.msra.gmra.mxu1 %v3179_v26 }
 0x1bd   : > { %v798_v5 = vmul.f32 %v3133_v38, %v780_v34  ;;  %v799_v6 = vmul.f32 %v3135_v39, %v784_v33 }
 0x1bf   : > { %1528 = vmatpush.msra.mxu2 %v798_v5  ;;  %1615 = vmatpush.msrb.mxu0 %v799_v6 }
 0x1c0   : > { %941 = vrot.lane.b32.xlu2 %v2859_v22, %s2453_s19 }
 0x1c1   : > { %1083 = vrot.lane.b32.xlu1 %v2952_v23, %s2454_s14  ;;  %949 = vrot.lane.b32.xlu0 %v2879_v36, %s2453_s19 }
 0x1c2   : > { %v769_v57 = vpop.permute.xlu2 %768 }
 0x1c3   : > { %v1180_v13 = vpop.permute.xlu1 %1179  ;;  %v773_v62 = vpop.permute.xlu0 %772 }
 0x1c4   : > { %v1192_v15 = vsel %vm728_vm1, %v1180_v13, %v1188_v3  ;;  %v1196_v16 = vsel %vm728_vm1, %v1188_v3, %v1180_v13  ;;  %v779_v17 = vsel %vm776_vm7, %v765_v51, %v773_v62  ;;  %v783_v44 = vsel %vm776_vm7, %v773_v62, %v765_v51  ;;  %v3184_v51 = vld [vmem:[%s3749_s3 + $0x18] sm:$0xff]  ;;  %1506 = vmatmul.f32.gmra.mxu1 %v3206_v47  ;;  %v1051_v13 = vld [vmem:[#allocation8 + $0x6] sm:$0x3] }
 0x1c5   : > { %v3171_v24 = vmul.f32 %v3157_v12, %v1196_v16  ;;  %v796_v63 = vmul.f32 %v3133_v38, %v779_v17  ;;  %v797_v29 = vmul.f32 %v3135_v39, %v783_v44  ;;  %v1209_v30 = vmul.f32 %v3159_v14, %v1192_v15  ;;  %1564 = vmatmul.f32.gmra.mxu3 %v3184_v51  ;;  %v3261_v62 = vld [vmem:[%s3749_s3 + $0x38] sm:$0xff] }
 0x1c6   : > { %1477 = vmatmul.f32.gmra.mxu0 %v3184_v51 }
 0x1c7   : > { %1529 = vmatpush.msra.mxu2 %v796_v63  ;;  %1616 = vmatpush.msrb.mxu0 %v797_v29 }
 0x1c8   : > { %1091 = vrot.lane.b32.xlu2 %v2955_v28, %s2454_s14  ;;  %1661 = vmatpush.msrb.mxu3 %v1209_v30  ;;  %v3282_v30 = vld [vmem:[%s3749_s3 + $0x28] sm:$0xff] }
 0x1c9   : > { %947 = vrot.lane.b32.xlu1 %v2902_v48, %s2453_s19  ;;  %939 = vrot.lane.b32.xlu0 %v2899_v46, %s2453_s19 }
 0x1ca   : > { %v3192_v52 = vpop.permute.xlu2 %1175 }
 0x1cb   : > { %v771_v3 = vpop.permute.xlu1 %770  ;;  %v763_v41 = vpop.permute.xlu0 %762 }
 0x1cc   : > { %v778_v42 = vsel %vm776_vm7, %v763_v41, %v771_v3  ;;  %v782_v60 = vsel %vm776_vm7, %v771_v3, %v763_v41  ;;  %1509 = vmatmul.f32.gmra.mxu1 %v3261_v62 }
 0x1cd   : > { %v794_v54 = vmul.f32 %v3133_v38, %v778_v42  ;;  %v795_v45 = vmul.f32 %v3135_v39, %v782_v60  ;;  %1567 = vmatmul.f32.gmra.mxu3 %v3213_v9 }
 0x1ce   : > { %1480 = vmatmul.f32.gmra.mxu0 %v3213_v9 }
 0x1cf   : > { %1530 = vmatpush.msra.mxu2 %v794_v54  ;;  %1617 = vmatpush.msrb.mxu0 %v795_v45 }
 0x1d0   : > { %1081 = vrot.lane.b32.xlu2 %v2988_v58, %s2454_s14 }
 0x1d1   : > { %937 = vrot.lane.b32.xlu1 %v2952_v23, %s2453_s19  ;;  %1089 = vrot.lane.b32.xlu0 %v2990_v50, %s2454_s14 }
 0x1d2   : > { %v1040_v61 = vpop.permute.xlu2 %1039 }
 0x1d3   : > { %v761_v18 = vpop.permute.xlu1 %760  ;;  %v1186_v31 = vpop.permute.xlu0 %1185 }
 0x1d4   : > { %v777_v0 = vsel %vm776_vm7, %v761_v18, %v769_v57  ;;  %v781_v2 = vsel %vm776_vm7, %v769_v57, %v761_v18  ;;  %v1191_v55 = vsel %vm728_vm1, %v3137_v1, %v1186_v31  ;;  %v1195_v33 = vsel %vm728_vm1, %v1186_v31, %v3137_v1  ;;  %v3241_v57 = vld [vmem:[%s3749_s3 + $0x10] sm:$0xff]  ;;  %v3256_v1 = vld [vmem:[%s3749_s3 + $0x48] sm:$0xff] }
 0x1d5   : > { %v3233_v34 = vmul.f32 %v3157_v12, %v1195_v33  ;;  %v792_v5 = vmul.f32 %v3133_v38, %v777_v0  ;;  %v793_v6 = vmul.f32 %v3135_v39, %v781_v2  ;;  %v1207_v7 = vmul.f32 %v3159_v14, %v1191_v55  ;;  %1570 = vmatmul.f32.gmra.mxu3 %v3256_v1  ;;  %v3352_v55 = vld [vmem:[%s3749_s3 + $0x58] sm:$0xff]  ;;  %v1151_v33 = vld [vmem:[#allocation8 + $0xc] sm:$0x3] }
 0x1d6   : > { %v3249_v38 = vperm.slane %v1051_v13, 1  ;;  %v3251_v39 = vperm.slane %v1051_v13, 0  ;;  %1483 = vmatmul.f32.gmra.mxu0 %v3256_v1 }
 0x1d7   : > { %1531 = vmatpush.msra.mxu2 %v792_v5  ;;  %1618 = vmatpush.msrb.mxu0 %v793_v6 }
 0x1d8   : > { %945 = vrot.lane.b32.xlu2 %v2955_v28, %s2453_s19  ;;  %1662 = vmatpush.msrb.mxu3 %v1207_v7 }
 0x1d9   : > { %2134 = vmatmul.msk.f32.vlgmr.msra.gmra.mxu2 %vm1445_vm8, %v3241_v57  ;;  %943 = vrot.lane.b32.xlu1 %v2990_v50, %s2453_s19 }
 0x1da   : > { %1574 = vmatpush.msrb.mxu2 %v2805_v40  ;;  %v3264_v15 = vpop.permute.xlu2 %1029  ;;  %935 = vrot.lane.b32.xlu0 %v2988_v58, %s2453_s19 }
 0x1db   : > { %v1042_v16 = vpop.permute.xlu1 %1041  ;;  %v1034_v17 = vpop.permute.xlu0 %1033 }
 0x1dc   : > { %1575 = vmatpush.msrb.mxu2 %v2841_v11  ;;  %v1046_v44 = vsel %vm576_vm0, %v1034_v17, %v1042_v16  ;;  %v1050_v63 = vsel %vm576_vm0, %v1042_v16, %v1034_v17  ;;  %v3290_v11 = vld [vmem:[%s3749_s3 + $0x50] sm:$0xff] }
 0x1dd   : > { %v1064_v40 = vmul.f32 %v3249_v38, %v1046_v44  ;;  %v1063_v29 = vmul.f32 %v3251_v39, %v1050_v63  ;;  %1512 = vmatmul.f32.gmra.mxu1 %v3290_v11 }
 0x1de   : > { %1576 = vmatpush.msrb.mxu2 %v2857_v21  ;;  %2138 = vmatmul.msk.f32.vlgmr.msrb.gmra.mxu0 %vm1445_vm8, %v3241_v57 }
 0x1df   : > { %1632 = vmatpush.msrb.mxu1 %v1063_v29  ;;  %1719 = vmatpush.msra.mxu0 %v1064_v40 }
 0x1e0   : > { %1577 = vmatpush.msrb.mxu2 %v2882_v37  ;;  %895 = vrot.lane.b32.xlu2 %v2859_v22, %s2455_s20 }
 0x1e1   : > { %2135 = vmatmul.msk.f32.gmra.mxu2 %vm1445_vm8, %v3282_v30  ;;  %893 = vrot.lane.b32.xlu1 %v2899_v46, %s2455_s20 }
 0x1e2   : > { %1578 = vmatpush.msrb.mxu2 %v2929_v10  ;;  %v1142_v21 = vpop.permute.xlu2 %1141  ;;  %903 = vrot.lane.b32.xlu0 %v2879_v36, %s2455_s20 }
 0x1e3   : > { %v1032_v37 = vpop.permute.xlu1 %1031  ;;  %v1184_v3 = vpop.permute.xlu0 %1183 }
 0x1e4   : > { %1579 = vmatpush.msrb.mxu2 %v2950_v49  ;;  %v1045_v41 = vsel %vm576_vm0, %v1032_v37, %v1040_v61  ;;  %v1049_v42 = vsel %vm576_vm0, %v1040_v61, %v1032_v37  ;;  %v1190_v10 = vsel %vm728_vm1, %v3192_v52, %v1184_v3  ;;  %v1194_v60 = vsel %vm728_vm1, %v1184_v3, %v3192_v52  ;;  %v3323_v61 = vld [vmem:[%s3749_s3 + $0x40] sm:$0xff] }
 0x1e5   : > { %v1062_v54 = vmul.f32 %v3249_v38, %v1045_v41  ;;  %v3315_v45 = vmul.f32 %v3157_v12, %v1194_v60  ;;  %v1061_v49 = vmul.f32 %v3251_v39, %v1049_v42  ;;  %v1205_v18 = vmul.f32 %v3159_v14, %v1190_v10 }
 0x1e6   : > { %1580 = vmatpush.msrb.mxu2 %v2986_v53  ;;  %2139 = vmatmul.msk.f32.gmra.mxu0 %vm1445_vm8, %v3282_v30 }
 0x1e7   : > { %1633 = vmatpush.msrb.mxu1 %v1061_v49  ;;  %1663 = vmatpush.msrb.mxu3 %v1205_v18 }
 0x1e8   : > { %1581 = vmatpush.msrb.mxu2 %v3024_v20  ;;  %901 = vrot.lane.b32.xlu2 %v2902_v48, %s2455_s20 }
 0x1e9   : > { %1720 = vmatpush.msra.mxu0 %v1062_v54  ;;  %2136 = vmatmul.msk.f32.gmra.mxu2 %vm1445_vm8, %v3323_v61 }
 0x1ea   : > { %1582 = vmatpush.msrb.mxu2 %v3043_v35  ;;  %v3331_v52 = vpop.permute.xlu2 %1131  ;;  %899 = vrot.lane.b32.xlu1 %v2955_v28, %s2455_s20 }
 0x1eb   : > { %891 = vrot.lane.b32.xlu0 %v2952_v23, %s2455_s20  ;;  %v1182_v53 = vpop.permute.xlu1 %1181  ;;  %v1174_v31 = vpop.permute.xlu0 %1173 }
 0x1ec   : > { %1583 = vmatpush.msrb.mxu2 %v3063_v59  ;;  %v1189_v20 = vsel %vm728_vm1, %v1174_v31, %v1182_v53  ;;  %v1193_v35 = vsel %vm728_vm1, %v1182_v53, %v1174_v31  ;;  %v3359_v59 = vperm.slane %v1151_v33, 1 }
 0x1ed   : > { %v3345_v0 = vmul.f32 %v3157_v12, %v1193_v35  ;;  %v1203_v2 = vmul.f32 %v3159_v14, %v1189_v20  ;;  %v3361_v12 = vperm.slane %v1151_v33, 0  ;;  %v1423_v20 = vld [vmem:[%s3750_s4 + $0x10] sm:$0xff] }
 0x1ee   : > { %1584 = vmatpush.msrb.mxu2 %v3092_v25  ;;  %2140 = vmatmul.msk.f32.gmra.mxu0 %vm1445_vm8, %v3323_v61 }
 0x1ef   : > { %1664 = vmatpush.msrb.mxu3 %v1203_v2 }
 0x1f0   : > { %1585 = vmatpush.msrb.mxu2 %v3106_v27  ;;  %889 = vrot.lane.b32.xlu2 %v2988_v58, %s2455_s20 }
 0x1f1   : > { %2137 = vmatmul.msk.f32.gmra.mxu2 %vm1445_vm8, %v3352_v55 }
 0x1f2   : > { %1586 = vmatpush.msrb.mxu2 %v2638_v19  ;;  %v996_v25 = vpop.permute.xlu2 %995  ;;  %1225 = vrot.lane.b32.xlu1 %v2859_v22, %s2456_s5 }
 0x1f3   : > { %897 = vrot.lane.b32.xlu0 %v2990_v50, %s2455_s20  ;;  %v1134_v27 = vpop.permute.xlu1 %1133  ;;  %v1038_v14 = vpop.permute.xlu0 %1037  ;;  %s2016_s20 = scalar_lea.hbm %s3753_s7, %s2191_s10 }
 0x1f4   : > { %1587 = vmatpush.msrb.mxu2 %v2650_v32  ;;  %v1146_v5 = vsel %vm680_vm3, %v1134_v27, %v1142_v21  ;;  %v1150_v19 = vsel %vm680_vm3, %v1142_v21, %v1134_v27  ;;  %v1044_v6 = vsel %vm576_vm0, %v3264_v15, %v1038_v14  ;;  %v1048_v7 = vsel %vm576_vm0, %v1038_v14, %v3264_v15  ;;  %v1005_v21 = vld [vmem:[#allocation8 + $0x4] sm:$0x3]  ;;  %s2019_s18 = sshll.u32 %s2016_s20, 4  ;;  %s2020_s18 = int_to_ptr.hbm [resolvable:$true] %s2019_s18 }
 0x1f5   : > { %v3382_v13 = vmul.f32 %v3359_v59, %v1150_v19  ;;  %v1060_v16 = vmul.f32 %v3249_v38, %v1044_v6  ;;  %v1059_v32 = vmul.f32 %v3251_v39, %v1048_v7  ;;  %v1163_v17 = vmul.f32 %v3361_v12, %v1146_v5  ;;  %v1422_v5 = vld [vmem:[%s3750_s4 + $0x8] sm:$0xff]  ;;  %v1421_v6 = vld [vmem:[%s3750_s4] sm:$0xff] }
 0x1f6   : > { %1588 = vmatpush.msrb.mxu2 %v2661_v43  ;;  %2141 = vmatmul.msk.f32.gmra.mxu0 %vm1445_vm8, %v3352_v55  ;;  %v3407_v37 = vperm.slane %v1005_v21, 1  ;;  %v3409_v3 = vperm.slane %v1005_v21, 0 }
 0x1f7   : > { %1634 = vmatpush.msrb.mxu1 %v1059_v32  ;;  %1665 = vmatpush.msrb.mxu3 %v1163_v17 }
 0x1f8   : > { %1589 = vmatpush.msrb.mxu2 %v2681_v56  ;;  %1233 = vrot.lane.b32.xlu2 %v2879_v36, %s2456_s5 }
 0x1f9   : > { %1721 = vmatpush.msra.mxu0 %v1060_v16  ;;  %1590 = vmatmul.f32.vlgmr.msrb.gmra.mxu2 %v3179_v26 }
 0x1fa   : > { %v986_v15 = vpop.permute.xlu2 %985  ;;  %1231 = vrot.lane.b32.xlu1 %v2902_v48, %s2456_s5 }
 0x1fb   : > { %1223 = vrot.lane.b32.xlu0 %v2899_v46, %s2456_s5  ;;  %v1036_v44 = vpop.permute.xlu1 %1035  ;;  %v1028_v63 = vpop.permute.xlu0 %1027 }
 0x1fc   : > { %v1043_v43 = vsel %vm576_vm0, %v1028_v63, %v1036_v44  ;;  %v1047_v56 = vsel %vm576_vm0, %v1036_v44, %v1028_v63 }
 0x1fd   : > { %v1058_v40 = vmul.f32 %v3249_v38, %v1043_v43  ;;  %v1057_v29 = vmul.f32 %v3251_v39, %v1047_v56 }
 0x1ff   : > { %1635 = vmatpush.msrb.mxu1 %v1057_v29  ;;  %1722 = vmatpush.msra.mxu0 %v1058_v40 }
 0x200   : > { %1221 = vrot.lane.b32.xlu2 %v2952_v23, %s2456_s5 }
 0x201   : > { %1593 = vmatmul.f32.gmra.mxu2 %v3206_v47 }
 0x202   : > { %v1136_v41 = vpop.permute.xlu2 %1135  ;;  %1219 = vrot.lane.b32.xlu1 %v2988_v58, %s2456_s5 }
 0x203   : > { %1229 = vrot.lane.b32.xlu0 %v2955_v28, %s2456_s5  ;;  %v988_v38 = vpop.permute.xlu1 %987  ;;  %v1140_v39 = vpop.permute.xlu0 %1139 }
 0x204   : > { %v1000_v42 = vsel %vm528_vm2, %v988_v38, %v996_v25  ;;  %v1004_v10 = vsel %vm528_vm2, %v996_v25, %v988_v38  ;;  %v1145_v60 = vsel %vm680_vm3, %v3331_v52, %v1140_v39  ;;  %v1149_v54 = vsel %vm680_vm3, %v1140_v39, %v3331_v52  ;;  %v1424_v52 = vld [vmem:[%s3750_s4 + $0x18] sm:$0xff] }
 0x205   : > { %v1018_v49 = vmul.f32 %v3407_v37, %v1000_v42  ;;  %v3427_v18 = vmul.f32 %v3359_v59, %v1149_v54  ;;  %v1017_v53 = vmul.f32 %v3409_v3, %v1004_v10  ;;  %v1161_v31 = vmul.f32 %v3361_v12, %v1145_v60  ;;  %v1105_v60 = vld [vmem:[#allocation8 + $0xa] sm:$0x3] }
 0x206   : > { %v1107_v54 = vperm.slane %v1105_v60, 0 }
 0x207   : > { %1636 = vmatpush.msrb.mxu1 %v1017_v53  ;;  %1666 = vmatpush.msrb.mxu3 %v1161_v31 }
 0x208   : > { %1227 = vrot.lane.b32.xlu2 %v2990_v50, %s2456_s5  ;;  %1723 = vmatpush.msra.mxu0 %v1018_v49  ;;  %s2382_s5 = sshra.s32 %s2020_s18, 4  ;;  %s2383_s5 = int_to_ptr.hbm [resolvable:$true] %s2382_s5 }
 0x209   : > { %1596 = vmatmul.f32.gmra.mxu2 %v3261_v62  ;;  %s2384_s21 = scalar_lea.hbm %s2383_s5, 128  ;;  %p2389_p11 = scmp.lt.s32.totalorder %s2383_s5, %s3753_s7 }
 0x20a   : > { %v1088_v35 = vpop.permute.xlu2 %1087  ;;  %1437 = vperm.xlu1 %2276, %v1423_v20   ;;  %p2385_p1 = scmp.ne.s32.totalorder %s2383_s5, %s2384_s21  ;;  %p2390_p9 = scmp.lt.s32.totalorder %s2388_s22, %s2384_s21 }
 0x20b   : > { %1442 = vperm.xlu0 %2275, %v1424_v52   ;;  %v1138_v2 = vpop.permute.xlu1 %1137  ;;  %v1130_v33 = vpop.permute.xlu0 %1129 }
 0x20c   : > { %v1144_v25 = vsel %vm680_vm3, %v1130_v33, %v1138_v2  ;;  %v1148_v27 = vsel %vm680_vm3, %v1138_v2, %v1130_v33  ;;  %p2386_p4 = pnand %p2385_p1, %p2567_p5  ;;  %p2391_p2 = por %p2390_p9, %p2389_p11 }
 0x20d   : > { %v3445_v14 = vmul.f32 %v3359_v59, %v1148_v27  ;;  %v1159_v19 = vmul.f32 %v3361_v12, %v1144_v25 }
 0x20e   : > { %p2387_p8 = pneg %p2386_p4 }
 0x20f   : > { %1667 = vmatpush.msrb.mxu3 %v1159_v19 }
 0x210   : > { %1432 = vperm.xlu2 %2277, %v1422_v5   ;;  %p2392_p10 = pnand %p2391_p2, %p2387_p8 }
 0x211   : > { %1599 = vmatmul.f32.gmra.mxu2 %v3290_v11 }
 0x212   : > { %v990_v7 = vpop.permute.xlu2 %989 }
 0x213   : > { %1427 = vperm.xlu0 %2275, %v1421_v6   ;;  %v1128_v16 = vpop.permute.xlu1 %1127  ;;  %v994_v32 = vpop.permute.xlu0 %993 }
 0x214   : > { %v1143_v17 = vsel %vm680_vm3, %v1128_v16, %v1136_v41  ;;  %v1147_v44 = vsel %vm680_vm3, %v1136_v41, %v1128_v16  ;;  %v999_v63 = vsel %vm528_vm2, %v986_v15, %v994_v32  ;;  %v1003_v43 = vsel %vm528_vm2, %v994_v32, %v986_v15 }
 0x215   : > { %v3464_v56 = vmul.f32 %v3359_v59, %v1147_v44  ;;  %v1016_v40 = vmul.f32 %v3407_v37, %v999_v63  ;;  %v1015_v29 = vmul.f32 %v3409_v3, %v1003_v43  ;;  %v1157_v21 = vmul.f32 %v3361_v12, %v1143_v17  ;;  %v959_v44 = vld [vmem:[#allocation8 + $0x2] sm:$0x3] }
 0x216   : > { %v1108_v12 = vperm.slane %v1105_v60, 1  ;;  %v962_v63 = vperm.slane %v959_v44, 1 }
 0x217   : > { %1637 = vmatpush.msrb.mxu1 %v1015_v29  ;;  %1668 = vmatpush.msrb.mxu3 %v1157_v21 }
 0x218   : > { %1724 = vmatpush.msra.mxu0 %v1016_v40 }
 0x21a   : > { %v942_v38 = vpop.permute.xlu2 %941 }
 0x21b   : > { %v992_v41 = vpop.permute.xlu1 %991  ;;  %v984_v39 = vpop.permute.xlu0 %983 }
 0x21c   : > { %v998_v42 = vsel %vm528_vm2, %v984_v39, %v992_v41  ;;  %v1002_v15 = vsel %vm528_vm2, %v992_v41, %v984_v39 }
 0x21d   : > { %v1014_v59 = vmul.f32 %v3407_v37, %v998_v42  ;;  %v1013_v10 = vmul.f32 %v3409_v3, %v1002_v15 }
 0x21f   : > { %1638 = vmatpush.msrb.mxu1 %v1013_v10  ;;  %1725 = vmatpush.msra.mxu0 %v1014_v59 }
 0x222   : > { %v1092_v49 = vpop.permute.xlu2 %1091 }
 0x223   : > { %v982_v53 = vpop.permute.xlu1 %981  ;;  %v1096_v31 = vpop.permute.xlu0 %1095 }
 0x224   : > { %v997_v20 = vsel %vm528_vm2, %v982_v53, %v990_v7  ;;  %v1001_v52 = vsel %vm528_vm2, %v990_v7, %v982_v53  ;;  %v1100_v2 = vsel %vm632_vm5, %v1088_v35, %v1096_v31  ;;  %v1104_v33 = vsel %vm632_vm5, %v1096_v31, %v1088_v35 }
 0x225   : > { %v1012_v25 = vmul.f32 %v3407_v37, %v997_v20  ;;  %v3484_v27 = vmul.f32 %v1108_v12, %v1104_v33  ;;  %v1011_v5 = vmul.f32 %v3409_v3, %v1001_v52  ;;  %v1117_v19 = vmul.f32 %v1107_v54, %v1100_v2 }
 0x226   : > { %v961_v3 = vperm.slane %v959_v44, 0 }
 0x227   : > { %1639 = vmatpush.msrb.mxu1 %v1011_v5  ;;  %1669 = vmatpush.msrb.mxu3 %v1117_v19 }
 0x228   : > { %1726 = vmatpush.msra.mxu0 %v1012_v25 }
 0x22a   : > { %v1082_v6 = vpop.permute.xlu2 %1081 }
 0x22b   : > { %v1094_v16 = vpop.permute.xlu1 %1093  ;;  %v1086_v32 = vpop.permute.xlu0 %1085 }
 0x22c   : > { %v1099_v7 = vsel %vm632_vm5, %v1086_v32, %v1094_v16  ;;  %v1103_v17 = vsel %vm632_vm5, %v1094_v16, %v1086_v32 }
 0x22d   : > { %v3491_v35 = vmul.f32 %v1108_v12, %v1103_v17  ;;  %v1115_v37 = vmul.f32 %v1107_v54, %v1099_v7 }
 0x22f   : > { %1670 = vmatpush.msrb.mxu3 %v1115_v37 }
 0x232   : > { %v946_v43 = vpop.permute.xlu2 %945 }
 0x233   : > { %v1084_v40 = vpop.permute.xlu1 %1083  ;;  %v950_v29 = vpop.permute.xlu0 %949 }
 0x234   : > { %v1098_v21 = vsel %vm632_vm5, %v1084_v40, %v1092_v49  ;;  %v1102_v41 = vsel %vm632_vm5, %v1092_v49, %v1084_v40  ;;  %v954_v39 = vsel %vm480_vm4, %v942_v38, %v950_v29  ;;  %v958_v42 = vsel %vm480_vm4, %v950_v29, %v942_v38 }
 0x235   : > { %v3501_v15 = vmul.f32 %v1108_v12, %v1102_v41  ;;  %v972_v59 = vmul.f32 %v962_v63, %v954_v39  ;;  %v971_v10 = vmul.f32 %v961_v3, %v958_v42  ;;  %v1113_v60 = vmul.f32 %v1107_v54, %v1098_v21  ;;  %v913_v39 = vld [vmem:[#allocation8] sm:$0x3] }
 0x236   : > { %v915_v42 = vperm.slane %v913_v39, 0 }
 0x237   : > { %1640 = vmatpush.msrb.mxu1 %v971_v10  ;;  %1671 = vmatpush.msrb.mxu3 %v1113_v60 }
 0x238   : > { %1727 = vmatpush.msra.mxu0 %v972_v59 }
 0x23a   : > { %v896_v52 = vpop.permute.xlu2 %895 }
 0x23b   : > { %v948_v53 = vpop.permute.xlu1 %947  ;;  %v940_v31 = vpop.permute.xlu0 %939 }
 0x23c   : > { %v953_v20 = vsel %vm480_vm4, %v940_v31, %v948_v53  ;;  %v957_v49 = vsel %vm480_vm4, %v948_v53, %v940_v31 }
 0x23d   : > { %v970_v2 = vmul.f32 %v962_v63, %v953_v20  ;;  %v969_v33 = vmul.f32 %v961_v3, %v957_v49 }
 0x23f   : > { %1641 = vmatpush.msrb.mxu1 %v969_v33  ;;  %1728 = vmatpush.msra.mxu0 %v970_v2 }
 0x242   : > { %v902_v40 = vpop.permute.xlu2 %901 }
 0x243   : > { %v938_v38 = vpop.permute.xlu1 %937  ;;  %v1090_v25 = vpop.permute.xlu0 %1089 }
 0x244   : > { %v952_v5 = vsel %vm480_vm4, %v938_v38, %v946_v43  ;;  %v956_v19 = vsel %vm480_vm4, %v946_v43, %v938_v38  ;;  %v1097_v16 = vsel %vm632_vm5, %v1082_v6, %v1090_v25  ;;  %v1101_v32 = vsel %vm632_vm5, %v1090_v25, %v1082_v6 }
 0x245   : > { %v968_v7 = vmul.f32 %v962_v63, %v952_v5  ;;  %v3515_v17 = vmul.f32 %v1108_v12, %v1101_v32  ;;  %v967_v37 = vmul.f32 %v961_v3, %v956_v19  ;;  %v1111_v44 = vmul.f32 %v1107_v54, %v1097_v16  ;;  %v3524_v12 = vpop.f32.mrf.mxu0  ;;  %v1243_v32 = vld [vmem:[#allocation8 + $0x10] sm:$0x3] }
 0x247   : > { %1642 = vmatpush.msrb.mxu1 %v967_v37  ;;  %1672 = vmatpush.msrb.mxu3 %v1111_v44  ;;  %v1245_v44 = vperm.slane %v1243_v32, 0 }
 0x248   : > { %1729 = vmatpush.msra.mxu0 %v968_v7  ;;  %v3545_v7 = vpop.f32.mrf.mxu1 }
 0x249   : > { %1673 = vmatpush.msrb.mxu3 %v2859_v22 }
 0x24a   : > { %v890_v22 = vpop.permute.xlu2 %889 }
 0x24b   : > { %v944_v29 = vpop.permute.xlu1 %943  ;;  %1674 = vmatpush.msrb.mxu3 %v2899_v46  ;;  %v916_v46 = vperm.slane %v913_v39, 1 }
 0x24c   : > { %v936_v43 = vpop.permute.xlu0 %935 }
 0x24d   : > { %v951_v21 = vsel %vm480_vm4, %v936_v43, %v944_v29  ;;  %v955_v6 = vsel %vm480_vm4, %v944_v29, %v936_v43  ;;  %1675 = vmatpush.msrb.mxu3 %v2952_v23  ;;  %v3536_v31 = vpop.f32.mrf.mxu0 }
 0x24e   : > { %v966_v54 = vmul.f32 %v962_v63, %v951_v21  ;;  %v965_v41 = vmul.f32 %v961_v3, %v955_v6 }
 0x24f   : > { %1676 = vmatpush.msrb.mxu3 %v2988_v58 }
 0x250   : > { %1643 = vmatpush.msrb.mxu1 %v965_v41  ;;  %1730 = vmatpush.msra.mxu0 %v966_v54 }
 0x251   : > { %1677 = vmatmul.f32.vlgmr.msrb.gmra.mxu3 %v3179_v26 }
 0x252   : > { %v1234_v2 = vpop.permute.xlu2 %1233 }
 0x253   : > { %v894_v59 = vpop.permute.xlu1 %893 }
 0x254   : > { %v904_v10 = vpop.permute.xlu0 %903  ;;  %v907_v60 = vsel %vm433_vm6, %v894_v59, %v902_v40  ;;  %v911_v23 = vsel %vm433_vm6, %v902_v40, %v894_v59  ;;  %v1246_v40 = vperm.slane %v1243_v32, 1 }
 0x255   : > { %v908_v63 = vsel %vm433_vm6, %v896_v52, %v904_v10  ;;  %v912_v58 = vsel %vm433_vm6, %v904_v10, %v896_v52  ;;  %v924_v20 = vmul.f32 %v916_v46, %v907_v60  ;;  %v923_v49 = vmul.f32 %v915_v42, %v911_v23  ;;  %v3547_v37 = vpop.f32.mrf.mxu0 }
 0x256   : > { %v926_v3 = vmul.f32 %v916_v46, %v908_v63  ;;  %v925_v53 = vmul.f32 %v915_v42, %v912_v58  ;;  %v1507_v58 = vpop.f32.mrf.mxu1 }
 0x258   : > { %1644 = vmatpush.msrb.mxu1 %v925_v53  ;;  %1731 = vmatpush.msra.mxu0 %v926_v3 }
 0x259   : > { %1680 = vmatmul.f32.gmra.mxu3 %v3206_v47 }
 0x25a   : > { %1645 = vmatpush.msrb.mxu1 %v923_v49  ;;  %1732 = vmatpush.msra.mxu0 %v924_v20  ;;  %v1222_v21 = vpop.permute.xlu2 %1221 }
 0x25c   : > { %v900_v33 = vpop.permute.xlu1 %899  ;;  %v3539_v38 = vpop.f32.mrf.mxu2 }
 0x25d   : > { %v892_v25 = vpop.permute.xlu0 %891  ;;  %v1484_v3 = vpop.f32.mrf.mxu0 }
 0x25e   : > { %v906_v52 = vsel %vm433_vm6, %v892_v25, %v900_v33  ;;  %v910_v5 = vsel %vm433_vm6, %v900_v33, %v892_v25 }
 0x25f   : > { %v922_v19 = vmul.f32 %v916_v46, %v906_v52  ;;  %v921_v16 = vmul.f32 %v915_v42, %v910_v5 }
 0x261   : > { %1646 = vmatpush.msrb.mxu1 %v921_v16  ;;  %1733 = vmatpush.msra.mxu0 %v922_v19 }
 0x262   : > { %1683 = vmatmul.f32.gmra.mxu3 %v3261_v62  ;;  %v1228_v49 = vpop.permute.xlu2 %1227 }
 0x264   : > { %v1226_v29 = vpop.permute.xlu1 %1225  ;;  %v3550_v43 = vpop.f32.mrf.mxu2 }
 0x265   : > { %v1238_v6 = vsel %vm776_vm7, %v1226_v29, %v1234_v2  ;;  %v1242_v54 = vsel %vm776_vm7, %v1234_v2, %v1226_v29  ;;  %v898_v41 = vpop.permute.xlu0 %897  ;;  %v3581_v5 = vpop.f32.mrf.mxu0 }
 0x266   : > { %v1255_v39 = vmul.f32 %v1245_v44, %v1238_v6  ;;  %v1256_v59 = vmul.f32 %v1246_v40, %v1242_v54  ;;  %v905_v10 = vsel %vm433_vm6, %v890_v22, %v898_v41  ;;  %v909_v60 = vsel %vm433_vm6, %v898_v41, %v890_v22 }
 0x267   : > { %v920_v23 = vmul.f32 %v916_v46, %v905_v10  ;;  %v919_v63 = vmul.f32 %v915_v42, %v909_v60 }
 0x268   : > { %1702 = vmatpush.msra.mxu2 %v1255_v39  ;;  %1789 = vmatpush.msra.mxu3 %v1256_v59 }
 0x269   : > { %1647 = vmatpush.msrb.mxu1 %v919_v63  ;;  %1734 = vmatpush.msra.mxu0 %v920_v23 }
 0x26a   : > { %1648 = vmatmul.f32.vlgmr.msrb.gmra.mxu1 %v3148_v8  ;;  %1735 = vmatmul.f32.vlgmr.msra.gmra.mxu0 %v3148_v8 }
 0x26b   : > { %1748 = vmatpush.msra.mxu1 %v3171_v24  ;;  %1686 = vmatmul.f32.gmra.mxu3 %v3290_v11  ;;  %v3572_v24 = vpop.f32.mrf.mxu3 }
 0x26c   : > { %v1232_v53 = vpop.permute.xlu1 %1231  ;;  %v1539_v20 = vpop.f32.mrf.mxu2 }
 0x26d   : > { %1749 = vmatpush.msra.mxu1 %v3233_v34  ;;  %v1224_v22 = vpop.permute.xlu0 %1223  ;;  %v1510_v34 = vpop.f32.mrf.mxu1 }
 0x26e   : > { %v1237_v46 = vsel %vm776_vm7, %v1224_v22, %v1232_v53  ;;  %v1241_v42 = vsel %vm776_vm7, %v1232_v53, %v1224_v22  ;;  %v1623_v41 = vpop.f32.mrf.mxu0 }
 0x26f   : > { %v1253_v2 = vmul.f32 %v1245_v44, %v1237_v46  ;;  %v1254_v8 = vmul.f32 %v1246_v40, %v1241_v42  ;;  %1750 = vmatpush.msra.mxu1 %v3315_v45 }
 0x271   : > { %1751 = vmatpush.msra.mxu1 %v3345_v0  ;;  %1703 = vmatpush.msra.mxu2 %v1253_v2 }
 0x272   : > { %1790 = vmatpush.msra.mxu3 %v1254_v8  ;;  %1651 = vmatmul.f32.gmra.mxu1 %v3184_v51 }
 0x273   : > { %1738 = vmatmul.f32.gmra.mxu0 %v3184_v51  ;;  %1752 = vmatpush.msra.mxu1 %v3382_v13 }
 0x274   : > { %v1220_v33 = vpop.permute.xlu1 %1219  ;;  %v1542_v25 = vpop.f32.mrf.mxu2 }
 0x275   : > { %1753 = vmatpush.msra.mxu1 %v3427_v18  ;;  %v1230_v52 = vpop.permute.xlu0 %1229  ;;  %v1235_v19 = vsel %vm776_vm7, %v1220_v33, %v1228_v49  ;;  %v1239_v51 = vsel %vm776_vm7, %v1228_v49, %v1220_v33  ;;  %v3588_v18 = vpop.permute.xlu2 %1432 }
 0x276   : > { %v1236_v45 = vsel %vm776_vm7, %v1222_v21, %v1230_v52  ;;  %v1240_v0 = vsel %vm776_vm7, %v1230_v52, %v1222_v21  ;;  %v1249_v32 = vmul.f32 %v1245_v44, %v1235_v19  ;;  %v1250_v29 = vmul.f32 %v1246_v40, %v1239_v51 }
 0x277   : > { %v1251_v13 = vmul.f32 %v1245_v44, %v1236_v45  ;;  %v1252_v16 = vmul.f32 %v1246_v40, %v1240_v0  ;;  %1754 = vmatpush.msra.mxu1 %v3445_v14  ;;  %v1479_v4 = vadd.f32 %v3536_v31, %v3588_v18 }
 0x279   : > { %1755 = vmatpush.msra.mxu1 %v3464_v56  ;;  %1704 = vmatpush.msra.mxu2 %v1251_v13  ;;  %v1508_v6 = vadd.f32 %v1507_v58, %v1479_v4 }
 0x27a   : > { %1791 = vmatpush.msra.mxu3 %v1252_v16  ;;  %1654 = vmatmul.f32.gmra.mxu1 %v3213_v9 }
 0x27b   : > { %1741 = vmatmul.f32.gmra.mxu0 %v3213_v9  ;;  %1756 = vmatpush.msra.mxu1 %v3484_v27  ;;  %v1513_v9 = vpop.f32.mrf.mxu1  ;;  %v1565_v27 = vpop.f32.mrf.mxu3  ;;  %v1537_v39 = vadd.f32 %v3550_v43, %v1508_v6 }
 0x27c   : > { %1705 = vmatpush.msra.mxu2 %v1249_v32  ;;  %1792 = vmatpush.msra.mxu3 %v1250_v29  ;;  %v3596_v14 = vpop.permute.xlu1 %1437  ;;  %v1591_v21 = vpop.f32.mrf.mxu2  ;;  %v3645_v29 = vld [vmem:[#allocation6] sm:$0xff] }
 0x27d   : > { %2142 = vmatmul.msk.f32.vlgmr.msra.gmra.mxu2 %vm1445_vm8, %v3241_v57  ;;  %1757 = vmatpush.msra.mxu1 %v3491_v35  ;;  %v1482_v56 = vadd.f32 %v3547_v37, %v3596_v14  ;;  %v3603_v44 = vpop.permute.xlu0 %1442  ;;  %v1626_v43 = vpop.f32.mrf.mxu0 }
 0x27e   : > { %v1485_v40 = vadd.f32 %v1484_v3, %v3603_v44  ;;  %2146 = vmatmul.msk.f32.vlgmr.msra.gmra.mxu3 %vm1445_vm8, %v3241_v57 }
 0x27f   : > { %v1511_v31 = vadd.f32 %v1510_v34, %v1482_v56  ;;  %1758 = vmatpush.msra.mxu1 %v3501_v15  ;;  %v1823_v56 = vld [vmem:[#allocation6 + $0x8] sm:$0xff] }
 0x280   : > { %v1514_v54 = vadd.f32 %v1513_v9, %v1485_v40 }
 0x281   : > { %1759 = vmatpush.msra.mxu1 %v3515_v17  ;;  %v1540_v37 = vadd.f32 %v1539_v20, %v1511_v31 }
 0x282   : > { %v1543_v35 = vadd.f32 %v1542_v25, %v1514_v54  ;;  %1657 = vmatmul.f32.gmra.mxu1 %v3256_v1 }
 0x283   : > { %1744 = vmatmul.f32.gmra.mxu0 %v3256_v1  ;;  %1760 = vmatpush.msra.mxu1 %v2879_v36  ;;  %v1568_v17 = vpop.f32.mrf.mxu3  ;;  %v1814_v60 = vmax.f32 %v1540_v37, 0.0  ;;  %v1810_v36 = vmax.f32 %v1537_v39, 0.0 }
 0x284   : > { %v1818_v59 = vmax.f32 %v1543_v35, 0.0  ;;  %v1594_v57 = vpop.f32.mrf.mxu2 }
 0x285   : > { %2143 = vmatmul.msk.f32.gmra.mxu2 %vm1445_vm8, %v3282_v30  ;;  %1761 = vmatpush.msra.mxu1 %v2902_v48  ;;  %v3617_v15 = vpop.permute.xlu0 %1427  ;;  %v1629_v58 = vpop.f32.mrf.mxu0 }
 0x286   : > { %v1476_v10 = vadd.f32 %v3524_v12, %v3617_v15  ;;  %1850 = vmatpush.msrb.mxu2 %v1818_v59  ;;  %2147 = vmatmul.msk.f32.gmra.mxu3 %vm1445_vm8, %v3282_v30  ;;  %v1569_v30 = vadd.f32 %v1568_v17, %v3596_v14  ;;  %v1824_v17 = vld [vmem:[#allocation6 + $0x10] sm:$0xff] }
 0x287   : > { %1762 = vmatpush.msra.mxu1 %v2955_v28 }
 0x288   : > { %v1505_v1 = vadd.f32 %v3545_v7, %v1476_v10  ;;  %1851 = vmatpush.msrb.mxu2 %v1814_v60 }
 0x289   : > { %1763 = vmatpush.msra.mxu1 %v2990_v50  ;;  %v1566_v50 = vadd.f32 %v1565_v27, %v3588_v18 }
 0x28a   : > { %1764 = vmatmul.f32.vlgmr.msra.gmra.mxu1 %v3179_v26  ;;  %1852 = vmatpush.msrb.mxu2 %v1810_v36  ;;  %v1534_v48 = vadd.f32 %v3539_v38, %v1505_v1  ;;  %v1563_v26 = vadd.f32 %v3572_v24, %v3617_v15 }
 0x28b   : > { %v1571_v28 = vpop.f32.mrf.mxu3  ;;  %v1595_v3 = vadd.f32 %v1594_v57, %v1566_v50 }
 0x28c   : > { %v1597_v12 = vpop.f32.mrf.mxu2  ;;  %v1806_v23 = vmax.f32 %v1534_v48, 0.0  ;;  %v1572_v7 = vadd.f32 %v1571_v28, %v3603_v44  ;;  %v1592_v53 = vadd.f32 %v1591_v21, %v1563_v26 }
 0x28d   : > { %2144 = vmatmul.msk.f32.gmra.mxu2 %vm1445_vm8, %v3323_v61  ;;  %v1598_v38 = vadd.f32 %v1597_v12, %v1569_v30  ;;  %v1624_v22 = vadd.f32 %v1623_v41, %v1595_v3 }
 0x28e   : > { %1853 = vmatpush.msrb.mxu2 %v1806_v23  ;;  %2148 = vmatmul.msk.f32.gmra.mxu3 %vm1445_vm8, %v3323_v61  ;;  %v1621_v49 = vadd.f32 %v3581_v5, %v1592_v53 }
 0x28f   : > { %v1811_v2 = vmax.f32 %v1624_v22, 0.0 }
 0x290   : > { %v1807_v8 = vmax.f32 %v1621_v49, 0.0 }
 0x292   : > { %1767 = vmatmul.f32.gmra.mxu1 %v3206_v47  ;;  %v1627_v47 = vadd.f32 %v1626_v43, %v1598_v38 }
 0x294   : > { %v1600_v63 = vpop.f32.mrf.mxu2  ;;  %v1815_v42 = vmax.f32 %v1627_v47, 0.0  ;;  %v1825_v47 = vld [vmem:[#allocation6 + $0x18] sm:$0xff] }
 0x295   : > { %2145 = vmatmul.msk.f32.gmra.mxu2 %vm1445_vm8, %v3352_v55  ;;  %v1601_v61 = vadd.f32 %v1600_v63, %v1572_v7 }
 0x296   : > { %2149 = vmatmul.msk.f32.gmra.mxu3 %vm1445_vm8, %v3352_v55 }
 0x297   : > { %v1630_v20 = vadd.f32 %v1629_v58, %v1601_v61 }
 0x299   : > { %v1819_v46 = vmax.f32 %v1630_v20, 0.0 }
 0x29a   : > { %1770 = vmatmul.f32.gmra.mxu1 %v3261_v62 }
 0x29b   : > { %1879 = vmatpush.msrb.mxu0 %v1819_v46 }
 0x29d   : > { %1880 = vmatpush.msrb.mxu0 %v1815_v42  ;;  %2150 = vmatmul.msk.f32.vlgmr.msrb.gmra.mxu2 %vm1445_vm8, %v3645_v29  ;;  %v1955_v42 = vld [vmem:[%s2600_s15 + $0x8] sm:$0xff] }
 0x29f   : > { %1881 = vmatpush.msrb.mxu0 %v1811_v2 }
 0x2a1   : > { %1882 = vmatpush.msrb.mxu0 %v1807_v8  ;;  %v1954_v8 = vld [vmem:[%s2600_s15] sm:$0xff] }
 0x2a2   : > { %1773 = vmatmul.f32.gmra.mxu1 %v3290_v11  ;;  %2154 = vmatmul.msk.f32.vlgmr.msrb.gmra.mxu0 %vm1445_vm8, %v3645_v29 }
 0x2a5   : > { %2151 = vmatmul.msk.f32.gmra.mxu2 %vm1445_vm8, %v1823_v56 }
 0x2aa   : > { %2155 = vmatmul.msk.f32.gmra.mxu0 %vm1445_vm8, %v1823_v56 }
 0x2ad   : > { %2152 = vmatmul.msk.f32.gmra.mxu2 %vm1445_vm8, %v1824_v17 }
 0x2b2   : > { %2156 = vmatmul.msk.f32.gmra.mxu0 %vm1445_vm8, %v1824_v17 }
 0x2b5   : > { %2153 = vmatmul.msk.f32.gmra.mxu2 %vm1445_vm8, %v1825_v47 }
 0x2ba   : > { %2157 = vmatmul.msk.f32.gmra.mxu0 %vm1445_vm8, %v1825_v47 }
 0x2d4   : > { %v1678_v24 = vpop.f32.mrf.mxu3 }
 0x2dc   : > { %v1681_v55 = vpop.f32.mrf.mxu3 }
 0x2e5   : > { %v1684_v33 = vpop.f32.mrf.mxu3 }
 0x2e7   : > { %v1649_v34 = vpop.f32.mrf.mxu1  ;;  %v1736_v0 = vpop.f32.mrf.mxu0 }
 0x2e8   : > { %v1650_v6 = vadd.f32 %v1649_v34, %v3617_v15  ;;  %v1737_v7 = vadd.f32 %v1736_v0, %v3617_v15 }
 0x2ea   : > { %v1679_v10 = vadd.f32 %v1678_v24, %v1650_v6 }
 0x2ee   : > { %v1687_v45 = vpop.f32.mrf.mxu3 }
 0x2ef   : > { %v1652_v25 = vpop.f32.mrf.mxu1 }
 0x2f0   : > { %v1739_v13 = vpop.f32.mrf.mxu0  ;;  %v1653_v40 = vadd.f32 %v1652_v25, %v3588_v18 }
 0x2f1   : > { %v1740_v23 = vadd.f32 %v1739_v13, %v3588_v18  ;;  %v1958_v13 = vld [vmem:[%s2600_s15 + $0x20] sm:$0xff] }
 0x2f2   : > { %v1682_v39 = vadd.f32 %v1681_v55, %v1653_v40 }
 0x2f7   : > { %v1655_v52 = vpop.f32.mrf.mxu1 }
 0x2f8   : > { %v1742_v21 = vpop.f32.mrf.mxu0  ;;  %v1656_v9 = vadd.f32 %v1655_v52, %v3596_v14  ;;  %v1956_v52 = vld [vmem:[%s2600_s15 + $0x10] sm:$0xff] }
 0x2f9   : > { %v1743_v48 = vadd.f32 %v1742_v21, %v3596_v14  ;;  %v1961_v21 = vld [vmem:[%s2600_s15 + $0x38] sm:$0xff] }
 0x2fa   : > { %v1685_v54 = vadd.f32 %v1684_v33, %v1656_v9  ;;  %v1957_v33 = vld [vmem:[%s2600_s15 + $0x18] sm:$0xff]  ;;  %v1960_v9 = vld [vmem:[%s2600_s15 + $0x30] sm:$0xff] }
 0x2ff   : > { %v1658_v62 = vpop.f32.mrf.mxu1 }
 0x300   : > { %v1707_v19 = vpop.f32.mrf.mxu2  ;;  %v1659_v27 = vadd.f32 %v1658_v62, %v3603_v44  ;;  %v1745_v60 = vpop.f32.mrf.mxu0 }
 0x301   : > { %v1794_v51 = vpop.f32.mrf.mxu3  ;;  %v1708_v43 = vadd.f32 %v1707_v19, %v1679_v10  ;;  %v1746_v28 = vadd.f32 %v1745_v60, %v3603_v44  ;;  %v1959_v19 = vld [vmem:[%s2600_s15 + $0x28] sm:$0xff]  ;;  %v2172_v10 = vld [vmem:[%s2600_s15 + $0x70] sm:$0xff] }
 0x302   : > { %v1688_v41 = vadd.f32 %v1687_v45, %v1659_v27  ;;  %v2168_v27 = vld [vmem:[%s2600_s15 + $0x50] sm:$0xff] }
 0x303   : > { %v1808_v58 = vmax.f32 %v1708_v43, 0.0  ;;  %v2171_v43 = vld [vmem:[%s2600_s15 + $0x68] sm:$0xff] }
 0x307   : > { %v1765_v5 = vpop.f32.mrf.mxu1 }
 0x308   : > { %v1710_v16 = vpop.f32.mrf.mxu2  ;;  %v1766_v3 = vadd.f32 %v1765_v5, %v1737_v7  ;;  %v2166_v5 = vld [vmem:[%s2600_s15 + $0x40] sm:$0xff] }
 0x309   : > { %v1797_v32 = vpop.f32.mrf.mxu3  ;;  %v1711_v36 = vadd.f32 %v1710_v16, %v1682_v39 }
 0x30a   : > { %v1795_v20 = vadd.f32 %v1794_v51, %v1766_v3 }
 0x30b   : > { %v1812_v50 = vmax.f32 %v1711_v36, 0.0 }
 0x30c   : > { %v1809_v46 = vmax.f32 %v1795_v20, 0.0 }
 0x30f   : > { %v1768_v11 = vpop.f32.mrf.mxu1 }
 0x310   : > { %v1713_v4 = vpop.f32.mrf.mxu2  ;;  %v1769_v63 = vadd.f32 %v1768_v11, %v1740_v23 }
 0x311   : > { %v1800_v31 = vpop.f32.mrf.mxu3  ;;  %v1714_v59 = vadd.f32 %v1713_v4, %v1685_v54 }
 0x312   : > { %v1798_v18 = vadd.f32 %v1797_v32, %v1769_v63 }
 0x313   : > { %v1816_v12 = vmax.f32 %v1714_v59, 0.0 }
 0x314   : > { %v1813_v15 = vmax.f32 %v1798_v18, 0.0 }
 0x317   : > { %v1771_v35 = vpop.f32.mrf.mxu1 }
 0x318   : > { %v1716_v37 = vpop.f32.mrf.mxu2  ;;  %v1772_v30 = vadd.f32 %v1771_v35, %v1743_v48  ;;  %v2170_v35 = vld [vmem:[%s2600_s15 + $0x60] sm:$0xff] }
 0x319   : > { %v1717_v57 = vadd.f32 %v1716_v37, %v1688_v41  ;;  %v1803_v38 = vpop.f32.mrf.mxu3  ;;  %v2167_v41 = vld [vmem:[%s2600_s15 + $0x48] sm:$0xff] }
 0x31a   : > { %v1801_v61 = vadd.f32 %v1800_v31, %v1772_v30 }
 0x31b   : > { %v1820_v1 = vmax.f32 %v1717_v57, 0.0 }
 0x31c   : > { %v1817_v22 = vmax.f32 %v1801_v61, 0.0 }
 0x31d   : > { %1908 = vmatpush.msrb.mxu1 %v1820_v1 }
 0x31f   : > { %1909 = vmatpush.msrb.mxu1 %v1816_v12  ;;  %v1774_v26 = vpop.f32.mrf.mxu1  ;;  %v1884_v49 = vpop.f32.mrf.mxu0 }
 0x320   : > { %v1775_v14 = vadd.f32 %v1774_v26, %v1746_v28  ;;  %v1963_v2 = vadd.f32 %v1955_v42, %v1884_v49  ;;  %v1855_v24 = vpop.f32.mrf.mxu2  ;;  %v2173_v28 = vld [vmem:[%s2600_s15 + $0x78] sm:$0xff] }
 0x321   : > { %1910 = vmatpush.msrb.mxu1 %v1812_v50  ;;  %v1962_v55 = vadd.f32 %v1954_v8, %v1855_v24 }
 0x322   : > { %v1804_v53 = vadd.f32 %v1803_v38, %v1775_v14  ;;  %1971 = vst [vmem:[%s3678_s23 + $0x8] sm:$0xff] %v1963_v2 }
 0x323   : > { %1911 = vmatpush.msrb.mxu1 %v1808_v58  ;;  %1970 = vst [vmem:[%s3678_s23] sm:$0xff] %v1962_v55 }
 0x324   : > { %v1821_v44 = vmax.f32 %v1804_v53, 0.0  ;;  %2158 = vmatmul.msk.f32.vlgmr.msrb.gmra.mxu1 %vm1445_vm8, %v3645_v29 }
 0x326   : > { %1937 = vmatpush.msrb.mxu3 %v1821_v44 }
 0x327   : > { %v1887_v34 = vpop.f32.mrf.mxu0 }
 0x328   : > { %1938 = vmatpush.msrb.mxu3 %v1817_v22  ;;  %v1965_v25 = vadd.f32 %v1957_v33, %v1887_v34  ;;  %v1858_v45 = vpop.f32.mrf.mxu2 }
 0x329   : > { %v1964_v0 = vadd.f32 %v1956_v52, %v1858_v45 }
 0x32a   : > { %1939 = vmatpush.msrb.mxu3 %v1813_v15  ;;  %1973 = vst [vmem:[%s3678_s23 + $0x18] sm:$0xff] %v1965_v25 }
 0x32b   : > { %1972 = vst [vmem:[%s3678_s23 + $0x10] sm:$0xff] %v1964_v0 }
 0x32c   : > { %1940 = vmatpush.msrb.mxu3 %v1809_v46  ;;  %2159 = vmatmul.msk.f32.gmra.mxu1 %vm1445_vm8, %v1823_v56 }
 0x32d   : > { %2162 = vmatmul.msk.f32.vlgmr.msrb.gmra.mxu3 %vm1445_vm8, %v3645_v29 }
 0x32f   : > { %v1890_v62 = vpop.f32.mrf.mxu0 }
 0x330   : > { %v1967_v51 = vadd.f32 %v1959_v19, %v1890_v62  ;;  %v1861_v16 = vpop.f32.mrf.mxu2 }
 0x331   : > { %v1966_v29 = vadd.f32 %v1958_v13, %v1861_v16 }
 0x332   : > { %1975 = vst [vmem:[%s3678_s23 + $0x28] sm:$0xff] %v1967_v51 }
 0x333   : > { %1974 = vst [vmem:[%s3678_s23 + $0x20] sm:$0xff] %v1966_v29 }
 0x334   : > { %2160 = vmatmul.msk.f32.gmra.mxu1 %vm1445_vm8, %v1824_v17 }
 0x335   : > { %2163 = vmatmul.msk.f32.gmra.mxu3 %vm1445_vm8, %v1823_v56 }
 0x337   : > { %v1893_v4 = vpop.f32.mrf.mxu0 }
 0x338   : > { %v1969_v56 = vadd.f32 %v1961_v21, %v1893_v4  ;;  %v1864_v40 = vpop.f32.mrf.mxu2 }
 0x339   : > { %v1968_v6 = vadd.f32 %v1960_v9, %v1864_v40 }
 0x33a   : > { %1977 = vst [vmem:[%s3678_s23 + $0x38] sm:$0xff] %v1969_v56 }
 0x33b   : > { %1976 = vst [vmem:[%s3678_s23 + $0x30] sm:$0xff] %v1968_v6 }
 0x33c   : > { %2161 = vmatmul.msk.f32.gmra.mxu1 %vm1445_vm8, %v1825_v47 }
 0x33d   : > { %2164 = vmatmul.msk.f32.gmra.mxu3 %vm1445_vm8, %v1824_v17  ;;  %v2169_v17 = vld [vmem:[%s2600_s15 + $0x58] sm:$0xff] }
 0x345   : > { %2165 = vmatmul.msk.f32.gmra.mxu3 %vm1445_vm8, %v1825_v47 }
 0x3a1   : > { %v1913_v32 = vpop.f32.mrf.mxu1 }
 0x3a2   : > { %v1986_v11 = vadd.f32 %v2166_v5, %v1913_v32 }
 0x3a4   : > { %2174 = vst [vmem:[%s3678_s23 + $0x40] sm:$0xff] %v1986_v11 }
 0x3a9   : > { %v1916_v31 = vpop.f32.mrf.mxu1 }
 0x3aa   : > { %v1988_v54 = vadd.f32 %v2168_v27, %v1916_v31 }
 0x3ac   : > { %2176 = vst [vmem:[%s3678_s23 + $0x50] sm:$0xff] %v1988_v54 }
 0x3b0   : > { %v1942_v37 = vpop.f32.mrf.mxu3 }
 0x3b1   : > { %v1987_v39 = vadd.f32 %v2167_v41, %v1942_v37  ;;  %v1919_v59 = vpop.f32.mrf.mxu1 }
 0x3b2   : > { %v1990_v57 = vadd.f32 %v2170_v35, %v1919_v59 }
 0x3b3   : > { %2175 = vst [vmem:[%s3678_s23 + $0x48] sm:$0xff] %v1987_v39 }
 0x3b4   : > { %2178 = vst [vmem:[%s3678_s23 + $0x60] sm:$0xff] %v1990_v57 }
 0x3b8   : > { %v1945_v60 = vpop.f32.mrf.mxu3 }
 0x3b9   : > { %v1989_v36 = vadd.f32 %v2169_v17, %v1945_v60  ;;  %v1922_v1 = vpop.f32.mrf.mxu1 }
 0x3ba   : > { %v1992_v48 = vadd.f32 %v2172_v10, %v1922_v1 }
 0x3bb   : > { %2177 = vst [vmem:[%s3678_s23 + $0x58] sm:$0xff] %v1989_v36 }
 0x3bc   : > { %2180 = vst [vmem:[%s3678_s23 + $0x70] sm:$0xff] %v1992_v48 }
 0x3c0   : > { %v1948_v12 = vpop.f32.mrf.mxu3 }
 0x3c1   : > { %v1991_v23 = vadd.f32 %v2171_v43, %v1948_v12 }
 0x3c3   : > { %2179 = vst [vmem:[%s3678_s23 + $0x68] sm:$0xff] %v1991_v23 }
 0x3c8   : > { %v1951_v30 = vpop.f32.mrf.mxu3 }
 0x3c9   : > { %v1993_v50 = vadd.f32 %v2173_v28, %v1951_v30 }
 0x3cb   : > { %2181 = vst [vmem:[%s3678_s23 + $0x78] sm:$0xff] %v1993_v50 }
 0x3cc   : > { %2395 = shalt.err (!%p2392_p10)
}
 0x3cd   : > { %s2457_s16 = smov 256  }
 0x3ce   : > { %2202 = dma.vmem_to_hbm [thread:$0]  (%p2567_p5), %s2018_s17, 2048, %s2020_s18, %s2004_s12, %s2457_s16, %s2457_s16, %s2453_s19  }
 0x3cf PF: > { %s2034_s23 = sand.u32 1, %s2426_s24   ;;  %p3761_p12 = scmp.ge.s32.totalorder %s2438_s27, 2 }
 0x3d0   : > { %s2035_s30 = scalar_lea.sflag [#allocation5], %s2034_s23 }
 0x3d1   : > { %p2216_p13 = pnand %p3761_p12, %p2533_p6 }
 0x3d3   : > { %p2217_p0 = pneg %p2216_p13 }
 0x3d5   : > { %2421 = dma.done.wait (%p2217_p0), %s2035_s30, 2048  }
 0x3d6   : > { %2423 = vsyncadd (%p2217_p0), %s2035_s30, 4294965248  ;;  %p21_p3 = scmp.ge.s32.totalorder %s2554_s29, 4   ;;  %s3762_s24 = smov %s2430_s25 }
 0x3d7   : > { %s3763_s25 = smov %s2434_s26  ;;  %s3764_s26 = smov %s2563_s13 }
 0x3d8   : > { %s3765_s27 = smov %s2554_s29  ;;  %23 = sbr.rel (!%p21_p3) target bundleno = 8 (0x8), region = 110 }
 0x3dd   :  { %2041 = vsyncpa [#allocation4], 1 }
 0x3de   :  { %2043 = vsyncpa [#allocation4 + $0x1], 1 }
 0x3df   :  { %2044 = vsyncpa [#allocation7], 1 }
 0x3e0   :  { %2045 = vsyncpa [#allocation5], 1 }
 0x3e1   :  { %2047 = vsyncpa [#allocation5 + $0x1], 1 }

</bundles_post_ra>
